<compile_context>
chip_gen: v7x
topology: tpu7x:2x2x1
jax: 0.10.0
libtpu: 0.0.40
codegen_flags: <defaults>
</compile_context>

<pallas_src>
import jax
import jax.numpy as jnp
from jax.experimental import pallas as pl
from jax.experimental.pallas import tpu as pltpu


def _round_up(n, m):
    return ((n + m - 1) // m) * m


# ----------------------------------------------------------------------------
# Fused SFU Pallas kernel
# ----------------------------------------------------------------------------
def sfu_kernel(x_ref, f_ref, wx_ref, wf_ref, b_ref, o_ref):
    x = x_ref[...].astype(jnp.float32)                   # (tm, I)
    # One fused projection: z = [zr | zg]  shape (tm, 2I), f32 accumulation.
    z = jnp.dot(x_ref[...], wx_ref[...], preferred_element_type=jnp.float32)
    z = z + jnp.dot(f_ref[...], wf_ref[...], preferred_element_type=jnp.float32)
    z = z + b_ref[...]
    I = o_ref.shape[-1]
    r = jnp.tanh(z[:, :I])
    # sigmoid(x) == 0.5 * tanh(0.5 x) + 0.5  -> keeps the transcendental on EUP.
    g = 0.5 * jnp.tanh(0.5 * z[:, I:]) + 0.5
    # o = g*r + (1-g)*x  ==  x + g*(r - x)
    o_ref[...] = (x + g * (r - x)).astype(o_ref.dtype)


def sfu_forward(x, fusions, w_r, b_r, w_g, b_g, *, tm_max=512):
    """x: (B, T, I), fusions: (B, T, F); w_*: (I, I+F) torch layout; b_*: (I,)."""
    B, T, I = x.shape
    Fsz = fusions.shape[-1]
    M = B * T

    # Trace-time weight prep: transpose, split into x / fusion halves, and fuse
    # the r and g projections along the output (lane) axis -> (.., 2I).
    wx = jnp.concatenate([w_r[:, :I].T, w_g[:, :I].T], axis=1)     # (I,  2I)
    wf = jnp.concatenate([w_r[:, I:].T, w_g[:, I:].T], axis=1)     # (F,  2I)
    bias = jnp.concatenate([b_r, b_g]).reshape(1, 2 * I)           # (1,  2I)

    x2 = x.reshape(M, I)
    f2 = fusions.reshape(M, Fsz)

    # Row tile: as large as sensible; zero-padded rather than asserted so tiny
    # M (e.g. M == batch when T == 1 inside the pointer loop) still works.
    tm = min(tm_max, _round_up(M, 8))
    M_pad = _round_up(M, tm)
    if M_pad != M:
        x2 = jnp.pad(x2, ((0, M_pad - M), (0, 0)))
        f2 = jnp.pad(f2, ((0, M_pad - M), (0, 0)))

    grid = (M_pad // tm,)
    out = pl.pallas_call(
        sfu_kernel,
        out_shape=jax.ShapeDtypeStruct((M_pad, I), x.dtype),
        grid_spec=pltpu.PrefetchScalarGridSpec(
            num_scalar_prefetch=0,
            grid=grid,
            in_specs=[
                pl.BlockSpec((tm, I), lambda i: (i, 0)),       # x rows
                pl.BlockSpec((tm, Fsz), lambda i: (i, 0)),     # fusion rows
                pl.BlockSpec((I, 2 * I), lambda i: (0, 0)),    # fused Wx
                pl.BlockSpec((Fsz, 2 * I), lambda i: (0, 0)),  # fused Wf
                pl.BlockSpec((1, 2 * I), lambda i: (0, 0)),    # fused bias
            ],
            out_specs=pl.BlockSpec((tm, I), lambda i: (i, 0)),
        ),
        compiler_params=pltpu.CompilerParams(
            dimension_semantics=("parallel",)),
    )(x2, f2, wx, wf, bias)
    return out[:M].reshape(B, T, I)


def sfu_reference(x, fusions, w_r, b_r, w_g, b_g):
    rf = jnp.concatenate([x, fusions], axis=2)
    r = jnp.tanh(rf @ w_r.T + b_r)
    g = jax.nn.sigmoid(rf @ w_g.T + b_g)
    return g * r + (1.0 - g) * x


# ----------------------------------------------------------------------------
# Fused FFN scorer Pallas kernel
#   s = relu(cat([x, z_, x*z_]) @ W1^T + b1) @ W2^T + b2,   z_ broadcast over T
# ----------------------------------------------------------------------------
def ffn_score_kernel(x_ref, wc_ref, c_ref, w2_ref, b2_ref, o_ref):
    # Single combined matmul replaces the three concat pieces.
    h = jnp.dot(x_ref[0], wc_ref[0], preferred_element_type=jnp.float32)
    h = jnp.maximum(h + c_ref[0], 0.0)                          # (tm, H)
    s = jnp.dot(h, w2_ref[...], preferred_element_type=jnp.float32) + b2_ref[...]
    o_ref[...] = s[None].astype(o_ref.dtype)                    # (1, tm, 1)


def ffn_score_forward(x, z, w1, b1, w2, b2, *, tm_max=256):
    """x: (B, T, D), z: (B, 1, D); torch layout w1: (H, 3D), b1: (H,),
    w2: (1, H), b2: (1,).  Returns scores (B, T)."""
    B, T, D = x.shape
    H = w1.shape[0]

    w1x = w1[:, :D].T                                   # (D, H)
    w1z = w1[:, D:2 * D].T                              # (D, H)
    w1xz = w1[:, 2 * D:].T                              # (D, H)
    zb = z[:, 0, :]                                     # (B, D)
    # Per-batch combined weight and bias (cheap, computed once in XLA):
    wc = w1x[None, :, :] + zb[:, :, None] * w1xz[None, :, :]     # (B, D, H)
    c = (zb @ w1z + b1)[:, None, :]                              # (B, 1, H)
    w2c = w2.T                                                   # (H, 1)
    b2c = b2.reshape(1, 1)                                       # (1, 1)

    tm = min(tm_max, _round_up(T, 8))
    T_pad = _round_up(T, tm)
    xp = x if T_pad == T else jnp.pad(x, ((0, 0), (0, T_pad - T), (0, 0)))

    grid = (B, T_pad // tm)
    out = pl.pallas_call(
        ffn_score_kernel,
        out_shape=jax.ShapeDtypeStruct((B, T_pad, 1), x.dtype),
        grid_spec=pltpu.PrefetchScalarGridSpec(
            num_scalar_prefetch=0,
            grid=grid,
            in_specs=[
                pl.BlockSpec((1, tm, D), lambda b, i: (b, i, 0)),   # x rows
                pl.BlockSpec((1, D, H), lambda b, i: (b, 0, 0)),    # combined W
                pl.BlockSpec((1, 1, H), lambda b, i: (b, 0, 0)),    # per-batch bias
                pl.BlockSpec((H, 1), lambda b, i: (0, 0)),          # w2
                pl.BlockSpec((1, 1), lambda b, i: (0, 0)),          # b2
            ],
            out_specs=pl.BlockSpec((1, tm, 1), lambda b, i: (b, i, 0)),
        ),
        compiler_params=pltpu.CompilerParams(
            dimension_semantics=("parallel", "parallel")),
    )(xp, wc, c, w2c, b2c)
    return out[:, :T, 0]


def ffn_score_reference(x, z, w1, b1, w2, b2):
    z_ = jnp.broadcast_to(z, x.shape)
    rf = jnp.concatenate([x, z_, x * z_], axis=2)
    h = jax.nn.relu(rf @ w1.T + b1)
    return (h @ w2.T + b2)[..., 0]


# ----------------------------------------------------------------------------
# MemoryAnsPointer forward (eval mode, dropout_rate=0, normalize=True)
# ----------------------------------------------------------------------------
def memory_ans_pointer_forward(params, x, y, x_mask, *, sfu_fn, ffn_fn,
                               normalize=True):
    # TODO(synk): masked softmax + attention pooling (1-lane, per-batch T-length
    # reductions) stay in XLA; a standalone Pallas kernel is unprofitable here.
    z_s = y[:, -1:, :]                                    # (B, 1, Y)
    s = e = None
    for p in params:
        s = ffn_fn(x, z_s, p["ffn_s_w1"], p["ffn_s_b1"],
                   p["ffn_s_w2"], p["ffn_s_b2"])
        s = jnp.where(x_mask, -jnp.inf, s)
        p_s = jax.nn.softmax(s, axis=1)
        u_s = jnp.einsum("bt,btd->bd", p_s, x)[:, None, :]
        z_e = sfu_fn(z_s, u_s, p["sfu_s_wr"], p["sfu_s_br"],
                     p["sfu_s_wg"], p["sfu_s_bg"])
        e = ffn_fn(x, z_e, p["ffn_e_w1"], p["ffn_e_b1"],
                   p["ffn_e_w2"], p["ffn_e_b2"])
        e = jnp.where(x_mask, -jnp.inf, e)
        p_e = jax.nn.softmax(e, axis=1)
        u_e = jnp.einsum("bt,btd->bd", p_e, x)[:, None, :]
        z_s = sfu_fn(z_e, u_e, p["sfu_e_wr"], p["sfu_e_br"],
                     p["sfu_e_wg"], p["sfu_e_bg"])
    if normalize:
        # eval-mode branch of the torch module (training uses log_softmax)
        p_s = jax.nn.softmax(s, axis=1)
        p_e = jax.nn.softmax(e, axis=1)
    else:
        p_s = jnp.exp(s)
        p_e = jnp.exp(e)
    return p_s, p_e


def init_params(key, x_size, y_size, hidden_size, hop):
    def lin(k, out_dim, in_dim):
        bound = 1.0 / (in_dim ** 0.5)
        kw, kb = jax.random.split(k)
        w = jax.random.uniform(kw, (out_dim, in_dim), jnp.float32, -bound, bound)
        b = jax.random.uniform(kb, (out_dim,), jnp.float32, -bound, bound)
        return w, b

    d_in = x_size + y_size + 2 * hidden_size
    c_sfu = y_size + 2 * hidden_size
    params = []
    for _ in range(hop):
        key, *ks = jax.random.split(key, 9)
        p = {}
        p["ffn_s_w1"], p["ffn_s_b1"] = lin(ks[0], hidden_size, d_in)
        p["ffn_s_w2"], p["ffn_s_b2"] = lin(ks[1], 1, hidden_size)
        p["sfu_s_wr"], p["sfu_s_br"] = lin(ks[2], y_size, c_sfu)
        p["sfu_s_wg"], p["sfu_s_bg"] = lin(ks[3], y_size, c_sfu)
        p["ffn_e_w1"], p["ffn_e_b1"] = lin(ks[4], hidden_size, d_in)
        p["ffn_e_w2"], p["ffn_e_b2"] = lin(ks[5], 1, hidden_size)
        p["sfu_e_wr"], p["sfu_e_br"] = lin(ks[6], y_size, c_sfu)
        p["sfu_e_wg"], p["sfu_e_bg"] = lin(ks[7], y_size, c_sfu)
        params.append(p)
    return params


if __name__ == "__main__":
    key = jax.random.PRNGKey(0)

    # ---- standalone SFU check (bigger M exercises the 512-row tile & 2-step grid)
    B, T = 2, 512
    input_size, fusion_size = 64, 64
    C = input_size + fusion_size
    k1, k2, k3, key = jax.random.split(key, 4)
    x = jax.random.normal(k1, (B, T, input_size), jnp.float32)
    fus = jax.random.normal(k2, (B, T, fusion_size), jnp.float32)
    bound = 1.0 / (C ** 0.5)
    kw = jax.random.split(k3, 4)
    w_r = jax.random.uniform(kw[0], (input_size, C), jnp.float32, -bound, bound)
    b_r = jax.random.uniform(kw[1], (input_size,), jnp.float32, -bound, bound)
    w_g = jax.random.uniform(kw[2], (input_size, C), jnp.float32, -bound, bound)
    b_g = jax.random.uniform(kw[3], (input_size,), jnp.float32, -bound, bound)

    out = jax.block_until_ready(sfu_forward(x, fus, w_r, b_r, w_g, b_g))
    ref = sfu_reference(x, fus, w_r, b_r, w_g, b_g)
    assert out.shape == ref.shape
    assert jnp.allclose(out, ref, atol=1e-5, rtol=1e-5)

    # ---- standalone FFN-scorer check (multi-tile grid over (B, T)) ------------
    hidden = 32
    d_ffn_in = 3 * input_size
    kz, kwf, key = jax.random.split(key, 3)
    z_big = jax.random.normal(kz, (B, 1, input_size), jnp.float32)
    kf = jax.random.split(kwf, 4)
    bf = 1.0 / (d_ffn_in ** 0.5)
    fw1 = jax.random.uniform(kf[0], (hidden, d_ffn_in), jnp.float32, -bf, bf)
    fb1 = jax.random.uniform(kf[1], (hidden,), jnp.float32, -bf, bf)
    bh = 1.0 / (hidden ** 0.5)
    fw2 = jax.random.uniform(kf[2], (1, hidden), jnp.float32, -bh, bh)
    fb2 = jax.random.uniform(kf[3], (1,), jnp.float32, -bh, bh)

    s_out = jax.block_until_ready(
        ffn_score_forward(x, z_big, fw1, fb1, fw2, fb2))
    s_ref = ffn_score_reference(x, z_big, fw1, fb1, fw2, fb2)
    assert s_out.shape == s_ref.shape
    assert jnp.allclose(s_out, s_ref, atol=1e-5, rtol=1e-4)

    # ---- full MemoryAnsPointer forward (eval mode) driven by Pallas kernels ---
    B, Tx, Ty = 2, 16, 8
    x_size = y_size = 2 * hidden   # so x * z_ broadcasts exactly as in the torch code
    kx, ky, kp, key = jax.random.split(key, 4)
    xm = jax.random.normal(kx, (B, Tx, x_size), jnp.float32)
    ym = jax.random.normal(ky, (B, Ty, y_size), jnp.float32)
    lengths = jnp.array([12, 16])
    x_mask = jnp.arange(Tx)[None, :] >= lengths[:, None]   # True = padded position
    params = init_params(kp, x_size, y_size, hidden, hop=2)

    fwd = jax.jit(lambda prm, a, b, m: memory_ans_pointer_forward(
        prm, a, b, m, sfu_fn=sfu_forward, ffn_fn=ffn_score_forward))
    p_s, p_e = fwd(params, xm, ym, x_mask)
    p_s = jax.block_until_ready(p_s)
    p_e = jax.block_until_ready(p_e)

    r_s, r_e = memory_ans_pointer_forward(
        params, xm, ym, x_mask, sfu_fn=sfu_reference, ffn_fn=ffn_score_reference)
    assert p_s.shape == (B, Tx) and p_e.shape == (B, Tx)
    assert jnp.allclose(p_s, r_s, atol=1e-5, rtol=1e-4)
    assert jnp.allclose(p_e, r_e, atol=1e-5, rtol=1e-4)

    print("KERNEL_OK")
</pallas_src>

<mosaic_0001>
module attributes {stable_mosaic.version = 11 : i64} {
  func.func @sfu_kernel(%arg0: i32, %arg1: memref<512x64xf32, #tpu.memory_space<vmem>>, %arg2: memref<512x64xf32, #tpu.memory_space<vmem>>, %arg3: memref<64x128xf32, #tpu.memory_space<vmem>>, %arg4: memref<64x128xf32, #tpu.memory_space<vmem>>, %arg5: memref<1x128xf32, #tpu.memory_space<vmem>>, %arg6: memref<512x64xf32, #tpu.memory_space<vmem>>) attributes {dimension_semantics = [#tpu.dimension_semantics<parallel>], iteration_bounds = array<i64: 2>, scalar_prefetch = 0 : i64, scratch_operands = 0 : i64, tpu.core_type = #tpu.core_type<tc>, window_params = [{transform_indices = @transform_0, window_bounds = array<i64: 512, 64>}, {transform_indices = @transform_1, window_bounds = array<i64: 512, 64>}, {pipeline_mode = #tpu.pipeline_mode<synchronous>, transform_indices = @transform_2, window_bounds = array<i64: 64, 128>}, {pipeline_mode = #tpu.pipeline_mode<synchronous>, transform_indices = @transform_3, window_bounds = array<i64: 64, 128>}, {pipeline_mode = #tpu.pipeline_mode<synchronous>, transform_indices = @transform_4, window_bounds = array<i64: 1, 128>}, {transform_indices = @transform_5, window_bounds = array<i64: 512, 64>}]} {
    %c0 = arith.constant 0 : index
    %c0_0 = arith.constant 0 : index
    %0 = vector.load %arg1[%c0, %c0_0] : memref<512x64xf32, #tpu.memory_space<vmem>>, vector<512x64xf32>
    %c0_1 = arith.constant 0 : index
    %c0_2 = arith.constant 0 : index
    %1 = vector.load %arg1[%c0_1, %c0_2] : memref<512x64xf32, #tpu.memory_space<vmem>>, vector<512x64xf32>
    %c0_3 = arith.constant 0 : index
    %c0_4 = arith.constant 0 : index
    %2 = vector.load %arg3[%c0_3, %c0_4] : memref<64x128xf32, #tpu.memory_space<vmem>>, vector<64x128xf32>
    %cst = arith.constant dense<0.000000e+00> : vector<512x128xf32>
    %3 = tpu.matmul %1, %2, %cst {dimension_numbers = #tpu.dot_dimension_numbers<[1], [0], [0], [1], [0, 0, 1, 1], [], []>} : vector<512x64xf32>, vector<64x128xf32>, vector<512x128xf32> -> vector<512x128xf32>
    %c0_5 = arith.constant 0 : index
    %c0_6 = arith.constant 0 : index
    %4 = vector.load %arg2[%c0_5, %c0_6] : memref<512x64xf32, #tpu.memory_space<vmem>>, vector<512x64xf32>
    %c0_7 = arith.constant 0 : index
    %c0_8 = arith.constant 0 : index
    %5 = vector.load %arg4[%c0_7, %c0_8] : memref<64x128xf32, #tpu.memory_space<vmem>>, vector<64x128xf32>
    %cst_9 = arith.constant dense<0.000000e+00> : vector<512x128xf32>
    %6 = tpu.matmul %4, %5, %cst_9 {dimension_numbers = #tpu.dot_dimension_numbers<[1], [0], [0], [1], [0, 0, 1, 1], [], []>} : vector<512x64xf32>, vector<64x128xf32>, vector<512x128xf32> -> vector<512x128xf32>
    %7 = arith.addf %3, %6 : vector<512x128xf32>
    %c0_10 = arith.constant 0 : index
    %c0_11 = arith.constant 0 : index
    %8 = vector.load %arg5[%c0_10, %c0_11] : memref<1x128xf32, #tpu.memory_space<vmem>>, vector<1x128xf32>
    %9 = vector.broadcast %8 : vector<1x128xf32> to vector<512x128xf32>
    %10 = arith.addf %7, %9 : vector<512x128xf32>
    %11 = vector.extract_strided_slice %10 {offsets = [0, 0], sizes = [512, 64], strides = [1, 1]} : vector<512x128xf32> to vector<512x64xf32>
    %12 = math.tanh %11 : vector<512x64xf32>
    %13 = vector.extract_strided_slice %10 {offsets = [0, 64], sizes = [512, 64], strides = [1, 1]} : vector<512x128xf32> to vector<512x64xf32>
    %cst_12 = arith.constant 5.000000e-01 : f32
    %14 = vector.broadcast %cst_12 : f32 to vector<512x64xf32>
    %15 = arith.mulf %14, %13 : vector<512x64xf32>
    %16 = math.tanh %15 : vector<512x64xf32>
    %cst_13 = arith.constant 5.000000e-01 : f32
    %17 = vector.broadcast %cst_13 : f32 to vector<512x64xf32>
    %18 = arith.mulf %17, %16 : vector<512x64xf32>
    %cst_14 = arith.constant 5.000000e-01 : f32
    %19 = vector.broadcast %cst_14 : f32 to vector<512x64xf32>
    %20 = arith.addf %18, %19 : vector<512x64xf32>
    %21 = arith.subf %12, %0 : vector<512x64xf32>
    %22 = arith.mulf %20, %21 : vector<512x64xf32>
    %23 = arith.addf %0, %22 : vector<512x64xf32>
    %c0_15 = arith.constant 0 : index
    %c0_16 = arith.constant 0 : index
    %24 = vector.load %arg6[%c0_15, %c0_16] : memref<512x64xf32, #tpu.memory_space<vmem>>, vector<512x64xf32>
    tpu.vector_store %arg6[%c0_15, %c0_16], %23 {strides = array<i32>} : memref<512x64xf32, #tpu.memory_space<vmem>>, vector<512x64xf32>,
    return
  }
  func.func @transform_0(%arg0: i32) -> (i32, i32) {
    %c0_i32 = arith.constant 0 : i32
    %c0_i32_0 = arith.constant 0 : i32
    return %arg0, %c0_i32 : i32, i32
  }
  func.func @transform_1(%arg0: i32) -> (i32, i32) {
    %c0_i32 = arith.constant 0 : i32
    %c0_i32_0 = arith.constant 0 : i32
    return %arg0, %c0_i32 : i32, i32
  }
  func.func @transform_2(%arg0: i32) -> (i32, i32) {
    %c0_i32 = arith.constant 0 : i32
    %c0_i32_0 = arith.constant 0 : i32
    %c0_i32_1 = arith.constant 0 : i32
    return %c0_i32, %c0_i32_0 : i32, i32
  }
  func.func @transform_3(%arg0: i32) -> (i32, i32) {
    %c0_i32 = arith.constant 0 : i32
    %c0_i32_0 = arith.constant 0 : i32
    %c0_i32_1 = arith.constant 0 : i32
    return %c0_i32, %c0_i32_0 : i32, i32
  }
  func.func @transform_4(%arg0: i32) -> (i32, i32) {
    %c0_i32 = arith.constant 0 : i32
    %c0_i32_0 = arith.constant 0 : i32
    %c0_i32_1 = arith.constant 0 : i32
    return %c0_i32, %c0_i32_0 : i32, i32
  }
  func.func @transform_5(%arg0: i32) -> (i32, i32) {
    %c0_i32 = arith.constant 0 : i32
    %c0_i32_0 = arith.constant 0 : i32
    return %arg0, %c0_i32 : i32, i32
  }
}

</mosaic_0001>

<bundles_post_ra>
// kernel: tpu_custom_call.1
= control target key start
LH: loop header
LB: loop body
LE: loop exit
PB: predicated region body
PF: predicated region fallthrough
CT: control target
= control target key end

     0   :  { %s3762_s18 = smov 0   ;;  %s4962_s0 = inlined_call_operand.vmem [shape: f32[1024,64], index: 0, kind: input, shape index: {}]   ;;  %s4963_s1 = inlined_call_operand.vmem [shape: f32[1024,64], index: 1, kind: input, shape index: {}]   ;;  %s4964_s2 = inlined_call_operand.vmem [shape: f32[64,128], index: 2, kind: input, shape index: {}]   ;;  %s4965_s3 = inlined_call_operand.vmem [shape: f32[64,128], index: 3, kind: input, shape index: {}]   ;;  %s4966_s4 = inlined_call_operand.vmem [shape: f32[1,128], index: 4, kind: input, shape index: {}]   ;;  %s4967_s5 = inlined_call_operand.vmem [shape: f32[1024,64], index: 5, kind: output, shape index: {}]  }
   0x1 LB: > { %s2776_s19 = sadd.s32 4294967295, %s3729_s18   ;;  %p2780_p0 = scmp.ge.s32.totalorder %s3729_s18, 1  ;;  %s3729_s18 = sphi %s3762_s18, %s15_s18  }
   0x2   : > { %p199_p1 = scmp.lt.s32.totalorder %s3729_s18, 3 }
   0x4   : > { %p200_p2 = pnand %p2780_p0, %p199_p1 }
   0x6   : > { %203 = sbr.rel (%p200_p2) target bundleno = 636 (0x27c), region = 40 }
   0xd   : > { %v386_v0 = vld [vmem:[%s4965_s3] sm:$0xff]  ;;  %v387_v1 = vld [vmem:[%s4965_s3 + $0x8] sm:$0xff]  ;;  %s2781_s26 = sshll.u32 %s2776_s19, 6  ;;  %v388_v5 = vld [vmem:[%s4965_s3 + $0x10] sm:$0xff]  ;;  %vm394_vm0 = vcmask 523264   ;;  %s3731_s13 = smov 64  }
   0xe   : > { %v314_v2 = vld [vmem:[%s4964_s2] sm:$0xff]  ;;  %v3286_v3 = vpack.c.bf16 %v387_v1, %v386_v0  ;;  %v315_v4 = vld [vmem:[%s4964_s2 + $0x8] sm:$0xff]  ;;  %v389_v6 = vld [vmem:[%s4965_s3 + $0x18] sm:$0xff]  ;;  %p233_p3 = scmp.lt.s32.totalorder %s2781_s26, 127 }
   0xf   : > { %v3302_v7 = vpack.c.bf16 %v315_v4, %v314_v2  ;;  %v3290_v8 = vpack.c.bf16 %v389_v6, %v388_v5  ;;  %v316_v9 = vld [vmem:[%s4964_s2 + $0x10] sm:$0xff]  ;;  %v317_v10 = vld [vmem:[%s4964_s2 + $0x18] sm:$0xff]  ;;  %v390_v11 = vld [vmem:[%s4965_s3 + $0x20] sm:$0xff] }
  0x10   : > { %3287 = vmatprep.subr.bf16.mxu1 %v3286_v3  ;;  %v3306_v12 = vpack.c.bf16 %v317_v10, %v316_v9  ;;  %v391_v13 = vld [vmem:[%s4965_s3 + $0x28] sm:$0xff]  ;;  %v318_v14 = vld [vmem:[%s4964_s2 + $0x20] sm:$0xff]  ;;  %s5047_s26 = smov (!%p233_p3, %s2781_s26), 127  ;;  %v392_v18 = vld [vmem:[%s4965_s3 + $0x30] sm:$0xff] }
  0x11   : > { %v319_v15 = vld [vmem:[%s4964_s2 + $0x28] sm:$0xff]  ;;  %3303 = vmatprep.subr.bf16.mxu0 %v3302_v7  ;;  %3289 = vmatpush3.bf16.msra.mxu1 %v3286_v3  ;;  %v3294_v16 = vpack.c.bf16 %v391_v13, %v390_v11  ;;  %s3806_s21 = sshll.u32 %s5047_s26, 3  ;;  %v393_v19 = vld [vmem:[%s4965_s3 + $0x38] sm:$0xff]  ;;  %v320_v20 = vld [vmem:[%s4964_s2 + $0x30] sm:$0xff] }
  0x12   : > { %3305 = vmatpush3.bf16.msra.mxu0 %v3302_v7  ;;  %3291 = vmatprep.subr.bf16.mxu1 %v3290_v8  ;;  %v3310_v17 = vpack.c.bf16 %v319_v15, %v318_v14  ;;  %s3821_s30 = scalar_lea.vmem %s4963_s1, %s3806_s21  ;;  %s3827_s8 = scalar_lea.vmem %s4962_s0, %s3806_s21  ;;  %v321_v21 = vld [vmem:[%s4964_s2 + $0x38] sm:$0xff]  ;;  %v3298_v24 = vpack.c.bf16 %v393_v19, %v392_v18 }
  0x13   : > { %3307 = vmatprep.subr.bf16.mxu0 %v3306_v12  ;;  %v322_v22 = vld [vmem:[%s3821_s30] sm:$0xff]  ;;  %v3314_v25 = vpack.c.bf16 %v321_v21, %v320_v20  ;;  %v323_v26 = vld [vmem:[%s3821_s30 + $0x8] sm:$0xff]  ;;  %v324_v28 = vld [vmem:[%s3821_s30 + $0x10] sm:$0xff]  ;;  %s4754_s16 = scalar_lea.vmem %s4967_s5, %s3806_s21 }
  0x14   : > { %v3834_v23 = vld [vmem:[%s3827_s8] sm:$0xff]  ;;  %3078 = vmatprep.mubr.msk.f32.mxu1 %vm394_vm0, %v322_v22  ;;  %v3841_v27 = vld [vmem:[%s3827_s8 + $0x8] sm:$0xff]  ;;  %v3845_v29 = vld [vmem:[%s3827_s8 + $0x10] sm:$0xff] }
  0x15   : > { %3293 = vmatpush3.bf16.msra.mxu1 %v3290_v8  ;;  %3190 = vmatprep.mubr.msk.f32.mxu0 %vm394_vm0, %v3834_v23  ;;  %v325_v30 = vld [vmem:[%s3821_s30 + $0x18] sm:$0xff]  ;;  %v326_v32 = vld [vmem:[%s3821_s30 + $0x20] sm:$0xff]  ;;  %v327_v34 = vld [vmem:[%s3821_s30 + $0x28] sm:$0xff] }
  0x16   : > { %3309 = vmatpush3.bf16.msra.mxu0 %v3306_v12  ;;  %3295 = vmatprep.subr.bf16.mxu1 %v3294_v16  ;;  %v3855_v31 = vld [vmem:[%s3827_s8 + $0x18] sm:$0xff]  ;;  %v3859_v33 = vld [vmem:[%s3827_s8 + $0x20] sm:$0xff]  ;;  %v3869_v35 = vld [vmem:[%s3827_s8 + $0x28] sm:$0xff] }
  0x17   : > { %3311 = vmatprep.subr.bf16.mxu0 %v3310_v17  ;;  %v328_v36 = vld [vmem:[%s3821_s30 + $0x30] sm:$0xff]  ;;  %v329_v38 = vld [vmem:[%s3821_s30 + $0x38] sm:$0xff]  ;;  %v330_v40 = vld [vmem:[%s3821_s30 + $0x40] sm:$0xff] }
  0x18   : > { %v3873_v37 = vld [vmem:[%s3827_s8 + $0x30] sm:$0xff]  ;;  %v3883_v39 = vld [vmem:[%s3827_s8 + $0x38] sm:$0xff]  ;;  %v3887_v41 = vld [vmem:[%s3827_s8 + $0x40] sm:$0xff] }
  0x19   : > { %3297 = vmatpush3.bf16.msra.mxu1 %v3294_v16  ;;  %v331_v42 = vld [vmem:[%s3821_s30 + $0x48] sm:$0xff]  ;;  %v332_v44 = vld [vmem:[%s3821_s30 + $0x50] sm:$0xff]  ;;  %v333_v46 = vld [vmem:[%s3821_s30 + $0x58] sm:$0xff] }
  0x1a   : > { %3313 = vmatpush3.bf16.msra.mxu0 %v3310_v17  ;;  %3299 = vmatprep.subr.bf16.mxu1 %v3298_v24  ;;  %v3897_v43 = vld [vmem:[%s3827_s8 + $0x48] sm:$0xff]  ;;  %v3901_v45 = vld [vmem:[%s3827_s8 + $0x50] sm:$0xff]  ;;  %v3911_v47 = vld [vmem:[%s3827_s8 + $0x58] sm:$0xff] }
  0x1b   : > { %3315 = vmatprep.subr.bf16.mxu0 %v3314_v25  ;;  %v334_v48 = vld [vmem:[%s3821_s30 + $0x60] sm:$0xff]  ;;  %v335_v50 = vld [vmem:[%s3821_s30 + $0x68] sm:$0xff]  ;;  %v336_v52 = vld [vmem:[%s3821_s30 + $0x70] sm:$0xff] }
  0x1c   : > { %v3915_v49 = vld [vmem:[%s3827_s8 + $0x60] sm:$0xff]  ;;  %v3925_v51 = vld [vmem:[%s3827_s8 + $0x68] sm:$0xff]  ;;  %v3929_v53 = vld [vmem:[%s3827_s8 + $0x70] sm:$0xff] }
  0x1d   : > { %3301 = vmatpush3.bf16.msra.mxu1 %v3298_v24  ;;  %v337_v54 = vld [vmem:[%s3821_s30 + $0x78] sm:$0xff]  ;;  %v338_v56 = vld [vmem:[%s3821_s30 + $0x80] sm:$0xff]  ;;  %v339_v58 = vld [vmem:[%s3821_s30 + $0x88] sm:$0xff] }
  0x1e   : > { %3317 = vmatpush3.bf16.msra.mxu0 %v3314_v25  ;;  %v3939_v55 = vld [vmem:[%s3827_s8 + $0x78] sm:$0xff]  ;;  %v3943_v57 = vld [vmem:[%s3827_s8 + $0x80] sm:$0xff]  ;;  %v3953_v59 = vld [vmem:[%s3827_s8 + $0x88] sm:$0xff] }
  0x1f   : > { %v340_v60 = vld [vmem:[%s3821_s30 + $0x90] sm:$0xff]  ;;  %v341_v62 = vld [vmem:[%s3821_s30 + $0x98] sm:$0xff]  ;;  %v342_v0 = vld [vmem:[%s3821_s30 + $0xa0] sm:$0xff] }
  0x20   : > { %3079 = vmatmul.mubr.msk.f32.vlgmr.msra.gmra.mrb[0].mxu1 %vm394_vm0, %v323_v26  ;;  %v3957_v61 = vld [vmem:[%s3827_s8 + $0x90] sm:$0xff]  ;;  %v3967_v63 = vld [vmem:[%s3827_s8 + $0x98] sm:$0xff]  ;;  %v3971_v1 = vld [vmem:[%s3827_s8 + $0xa0] sm:$0xff] }
  0x21   : > { %3191 = vmatmul.mubr.msk.f32.vlgmr.msra.gmra.mrb[0].mxu0 %vm394_vm0, %v3841_v27  ;;  %3081 = vmatprep.mubr.msk.f32.mxu1 %vm394_vm0, %v324_v28  ;;  %v343_v2 = vld [vmem:[%s3821_s30 + $0xa8] sm:$0xff]  ;;  %v344_v4 = vld [vmem:[%s3821_s30 + $0xb0] sm:$0xff]  ;;  %v345_v6 = vld [vmem:[%s3821_s30 + $0xb8] sm:$0xff] }
  0x22   : > { %3193 = vmatprep.mubr.msk.f32.mxu0 %vm394_vm0, %v3845_v29  ;;  %v3981_v3 = vld [vmem:[%s3827_s8 + $0xa8] sm:$0xff]  ;;  %v3985_v5 = vld [vmem:[%s3827_s8 + $0xb0] sm:$0xff]  ;;  %v3995_v7 = vld [vmem:[%s3827_s8 + $0xb8] sm:$0xff] }
  0x23   : > { %v346_v8 = vld [vmem:[%s3821_s30 + $0xc0] sm:$0xff]  ;;  %v347_v10 = vld [vmem:[%s3821_s30 + $0xc8] sm:$0xff]  ;;  %v348_v12 = vld [vmem:[%s3821_s30 + $0xd0] sm:$0xff] }
  0x24   : > { %3082 = vmatmul.mubr.msk.f32.gmra.mrb[2].mxu1 %vm394_vm0, %v325_v30  ;;  %v3999_v9 = vld [vmem:[%s3827_s8 + $0xc0] sm:$0xff]  ;;  %v4009_v11 = vld [vmem:[%s3827_s8 + $0xc8] sm:$0xff]  ;;  %v4013_v13 = vld [vmem:[%s3827_s8 + $0xd0] sm:$0xff] }
  0x25   : > { %3194 = vmatmul.mubr.msk.f32.gmra.mrb[2].mxu0 %vm394_vm0, %v3855_v31  ;;  %3084 = vmatprep.mubr.msk.f32.mxu1 %vm394_vm0, %v326_v32  ;;  %v349_v14 = vld [vmem:[%s3821_s30 + $0xd8] sm:$0xff]  ;;  %v350_v16 = vld [vmem:[%s3821_s30 + $0xe0] sm:$0xff]  ;;  %v351_v18 = vld [vmem:[%s3821_s30 + $0xe8] sm:$0xff] }
  0x26   : > { %3196 = vmatprep.mubr.msk.f32.mxu0 %vm394_vm0, %v3859_v33  ;;  %v4023_v15 = vld [vmem:[%s3827_s8 + $0xd8] sm:$0xff]  ;;  %v4027_v17 = vld [vmem:[%s3827_s8 + $0xe0] sm:$0xff]  ;;  %v4037_v19 = vld [vmem:[%s3827_s8 + $0xe8] sm:$0xff] }
  0x27   : > { %v352_v20 = vld [vmem:[%s3821_s30 + $0xf0] sm:$0xff]  ;;  %v353_v22 = vld [vmem:[%s3821_s30 + $0xf8] sm:$0xff]  ;;  %v354_v25 = vld [vmem:[%s3821_s30 + $0x100] sm:$0xff] }
  0x28   : > { %3085 = vmatmul.mubr.msk.f32.gmra.mrb[4].mxu1 %vm394_vm0, %v327_v34  ;;  %v4041_v21 = vld [vmem:[%s3827_s8 + $0xf0] sm:$0xff]  ;;  %v4051_v24 = vld [vmem:[%s3827_s8 + $0xf8] sm:$0xff]  ;;  %v4055_v26 = vld [vmem:[%s3827_s8 + $0x100] sm:$0xff] }
  0x29   : > { %3197 = vmatmul.mubr.msk.f32.gmra.mrb[4].mxu0 %vm394_vm0, %v3869_v35  ;;  %3087 = vmatprep.mubr.msk.f32.mxu1 %vm394_vm0, %v328_v36  ;;  %v355_v28 = vld [vmem:[%s3821_s30 + $0x108] sm:$0xff]  ;;  %v356_v32 = vld [vmem:[%s3821_s30 + $0x110] sm:$0xff]  ;;  %v357_v36 = vld [vmem:[%s3821_s30 + $0x118] sm:$0xff] }
  0x2a   : > { %3199 = vmatprep.mubr.msk.f32.mxu0 %vm394_vm0, %v3873_v37  ;;  %v4065_v30 = vld [vmem:[%s3827_s8 + $0x108] sm:$0xff]  ;;  %v4069_v34 = vld [vmem:[%s3827_s8 + $0x110] sm:$0xff] }
  0x2c   : > { %3088 = vmatmul.mubr.msk.f32.gmra.mrb[6].mxu1 %vm394_vm0, %v329_v38  ;;  %v4079_v38 = vld [vmem:[%s3827_s8 + $0x118] sm:$0xff] }
  0x2d   : > { %3200 = vmatmul.mubr.msk.f32.gmra.mrb[6].mxu0 %vm394_vm0, %v3883_v39  ;;  %3090 = vmatprep.mubr.msk.f32.mxu1 %vm394_vm0, %v330_v40  ;;  %v358_v40 = vld [vmem:[%s3821_s30 + $0x120] sm:$0xff] }
  0x2e   : > { %3202 = vmatprep.mubr.msk.f32.mxu0 %vm394_vm0, %v3887_v41 }
  0x30   : > { %3091 = vmatmul.mubr.msk.f32.gmra.mrb[8].mxu1 %vm394_vm0, %v331_v42  ;;  %v4083_v42 = vld [vmem:[%s3827_s8 + $0x120] sm:$0xff] }
  0x31   : > { %3203 = vmatmul.mubr.msk.f32.gmra.mrb[8].mxu0 %vm394_vm0, %v3897_v43  ;;  %3093 = vmatprep.mubr.msk.f32.mxu1 %vm394_vm0, %v332_v44  ;;  %v359_v44 = vld [vmem:[%s3821_s30 + $0x128] sm:$0xff] }
  0x32   : > { %3205 = vmatprep.mubr.msk.f32.mxu0 %vm394_vm0, %v3901_v45 }
  0x34   : > { %3094 = vmatmul.mubr.msk.f32.gmra.mrb[10].mxu1 %vm394_vm0, %v333_v46  ;;  %v4093_v46 = vld [vmem:[%s3827_s8 + $0x128] sm:$0xff] }
  0x35   : > { %3206 = vmatmul.mubr.msk.f32.gmra.mrb[10].mxu0 %vm394_vm0, %v3911_v47  ;;  %3096 = vmatprep.mubr.msk.f32.mxu1 %vm394_vm0, %v334_v48  ;;  %v360_v48 = vld [vmem:[%s3821_s30 + $0x130] sm:$0xff] }
  0x36   : > { %3208 = vmatprep.mubr.msk.f32.mxu0 %vm394_vm0, %v3915_v49 }
  0x38   : > { %3097 = vmatmul.mubr.msk.f32.gmra.mrb[12].mxu1 %vm394_vm0, %v335_v50  ;;  %v4097_v50 = vld [vmem:[%s3827_s8 + $0x130] sm:$0xff] }
  0x39   : > { %3209 = vmatmul.mubr.msk.f32.gmra.mrb[12].mxu0 %vm394_vm0, %v3925_v51  ;;  %3099 = vmatprep.mubr.msk.f32.mxu1 %vm394_vm0, %v336_v52  ;;  %v361_v52 = vld [vmem:[%s3821_s30 + $0x138] sm:$0xff] }
  0x3a   : > { %3211 = vmatprep.mubr.msk.f32.mxu0 %vm394_vm0, %v3929_v53 }
  0x3c   : > { %3100 = vmatmul.mubr.msk.f32.gmra.mrb[14].mxu1 %vm394_vm0, %v337_v54  ;;  %v4107_v54 = vld [vmem:[%s3827_s8 + $0x138] sm:$0xff] }
  0x3d   : > { %3212 = vmatmul.mubr.msk.f32.gmra.mrb[14].mxu0 %vm394_vm0, %v3939_v55  ;;  %3102 = vmatprep.mubr.msk.f32.mxu1 %vm394_vm0, %v338_v56  ;;  %v362_v56 = vld [vmem:[%s3821_s30 + $0x140] sm:$0xff] }
  0x3e   : > { %3214 = vmatprep.mubr.msk.f32.mxu0 %vm394_vm0, %v3943_v57 }
  0x40   : > { %3103 = vmatmul.mubr.msk.f32.gmra.mrb[16].mxu1 %vm394_vm0, %v339_v58  ;;  %v4111_v58 = vld [vmem:[%s3827_s8 + $0x140] sm:$0xff] }
  0x41   : > { %3215 = vmatmul.mubr.msk.f32.gmra.mrb[16].mxu0 %vm394_vm0, %v3953_v59  ;;  %3105 = vmatprep.mubr.msk.f32.mxu1 %vm394_vm0, %v340_v60  ;;  %v363_v60 = vld [vmem:[%s3821_s30 + $0x148] sm:$0xff] }
  0x42   : > { %3217 = vmatprep.mubr.msk.f32.mxu0 %vm394_vm0, %v3957_v61 }
  0x44   : > { %3106 = vmatmul.mubr.msk.f32.gmra.mrb[18].mxu1 %vm394_vm0, %v341_v62  ;;  %v4121_v62 = vld [vmem:[%s3827_s8 + $0x148] sm:$0xff] }
  0x45   : > { %3218 = vmatmul.mubr.msk.f32.gmra.mrb[18].mxu0 %vm394_vm0, %v3967_v63  ;;  %3108 = vmatprep.mubr.msk.f32.mxu1 %vm394_vm0, %v342_v0  ;;  %v364_v0 = vld [vmem:[%s3821_s30 + $0x150] sm:$0xff] }
  0x46   : > { %3220 = vmatprep.mubr.msk.f32.mxu0 %vm394_vm0, %v3971_v1 }
  0x48   : > { %3109 = vmatmul.mubr.msk.f32.gmra.mrb[20].mxu1 %vm394_vm0, %v343_v2  ;;  %v4125_v2 = vld [vmem:[%s3827_s8 + $0x150] sm:$0xff] }
  0x49   : > { %3221 = vmatmul.mubr.msk.f32.gmra.mrb[20].mxu0 %vm394_vm0, %v3981_v3  ;;  %3111 = vmatprep.mubr.msk.f32.mxu1 %vm394_vm0, %v344_v4  ;;  %v365_v4 = vld [vmem:[%s3821_s30 + $0x158] sm:$0xff] }
  0x4a   : > { %3223 = vmatprep.mubr.msk.f32.mxu0 %vm394_vm0, %v3985_v5 }
  0x4c   : > { %3112 = vmatmul.mubr.msk.f32.gmra.mrb[22].mxu1 %vm394_vm0, %v345_v6  ;;  %v4135_v6 = vld [vmem:[%s3827_s8 + $0x158] sm:$0xff] }
  0x4d   : > { %3224 = vmatmul.mubr.msk.f32.gmra.mrb[22].mxu0 %vm394_vm0, %v3995_v7  ;;  %3114 = vmatprep.mubr.msk.f32.mxu1 %vm394_vm0, %v346_v8  ;;  %v366_v8 = vld [vmem:[%s3821_s30 + $0x160] sm:$0xff] }
  0x4e   : > { %3226 = vmatprep.mubr.msk.f32.mxu0 %vm394_vm0, %v3999_v9 }
  0x50   : > { %3115 = vmatmul.mubr.msk.f32.gmra.mrb[24].mxu1 %vm394_vm0, %v347_v10  ;;  %v4139_v10 = vld [vmem:[%s3827_s8 + $0x160] sm:$0xff] }
  0x51   : > { %3227 = vmatmul.mubr.msk.f32.gmra.mrb[24].mxu0 %vm394_vm0, %v4009_v11  ;;  %3117 = vmatprep.mubr.msk.f32.mxu1 %vm394_vm0, %v348_v12  ;;  %v367_v12 = vld [vmem:[%s3821_s30 + $0x168] sm:$0xff] }
  0x52   : > { %3229 = vmatprep.mubr.msk.f32.mxu0 %vm394_vm0, %v4013_v13 }
  0x54   : > { %3118 = vmatmul.mubr.msk.f32.gmra.mrb[26].mxu1 %vm394_vm0, %v349_v14  ;;  %v4149_v14 = vld [vmem:[%s3827_s8 + $0x168] sm:$0xff] }
  0x55   : > { %3230 = vmatmul.mubr.msk.f32.gmra.mrb[26].mxu0 %vm394_vm0, %v4023_v15  ;;  %3120 = vmatprep.mubr.msk.f32.mxu1 %vm394_vm0, %v350_v16  ;;  %v368_v16 = vld [vmem:[%s3821_s30 + $0x170] sm:$0xff] }
  0x56   : > { %3232 = vmatprep.mubr.msk.f32.mxu0 %vm394_vm0, %v4027_v17 }
  0x58   : > { %3121 = vmatmul.mubr.msk.f32.gmra.mrb[28].mxu1 %vm394_vm0, %v351_v18  ;;  %v4153_v18 = vld [vmem:[%s3827_s8 + $0x170] sm:$0xff] }
  0x59   : > { %3233 = vmatmul.mubr.msk.f32.gmra.mrb[28].mxu0 %vm394_vm0, %v4037_v19  ;;  %3123 = vmatprep.mubr.msk.f32.mxu1 %vm394_vm0, %v352_v20  ;;  %v369_v20 = vld [vmem:[%s3821_s30 + $0x178] sm:$0xff] }
  0x5a   : > { %3235 = vmatprep.mubr.msk.f32.mxu0 %vm394_vm0, %v4041_v21 }
  0x5c   : > { %3124 = vmatmul.mubr.msk.f32.gmra.mrb[30].mxu1 %vm394_vm0, %v353_v22  ;;  %v4163_v22 = vld [vmem:[%s3827_s8 + $0x178] sm:$0xff] }
  0x5d   : > { %3236 = vmatmul.mubr.msk.f32.gmra.mrb[30].mxu0 %vm394_vm0, %v4051_v24  ;;  %3126 = vmatprep.mubr.msk.f32.mxu1 %vm394_vm0, %v354_v25  ;;  %4994 = vst [vmem:[#allocation2_spill] sm:$0xff] %v4163_v22  ;;  %v370_v25 = vld [vmem:[%s3821_s30 + $0x180] sm:$0xff] }
  0x5e   : > { %3238 = vmatprep.mubr.msk.f32.mxu0 %vm394_vm0, %v4055_v26 }
  0x60   : > { %3127 = vmatmul.mubr.msk.f32.gmra.mrb[32].mxu1 %vm394_vm0, %v355_v28  ;;  %v4167_v28 = vld [vmem:[%s3827_s8 + $0x180] sm:$0xff] }
  0x61   : > { %3239 = vmatmul.mubr.msk.f32.gmra.mrb[32].mxu0 %vm394_vm0, %v4065_v30  ;;  %3129 = vmatprep.mubr.msk.f32.mxu1 %vm394_vm0, %v356_v32  ;;  %4995 = vst [vmem:[#allocation3_spill] sm:$0xff] %v4167_v28  ;;  %v371_v32 = vld [vmem:[%s3821_s30 + $0x188] sm:$0xff] }
  0x62   : > { %3241 = vmatprep.mubr.msk.f32.mxu0 %vm394_vm0, %v4069_v34 }
  0x64   : > { %3130 = vmatmul.mubr.msk.f32.gmra.mrb[34].mxu1 %vm394_vm0, %v357_v36  ;;  %v4177_v36 = vld [vmem:[%s3827_s8 + $0x188] sm:$0xff] }
  0x65   : > { %3242 = vmatmul.mubr.msk.f32.gmra.mrb[34].mxu0 %vm394_vm0, %v4079_v38  ;;  %3132 = vmatprep.mubr.msk.f32.mxu1 %vm394_vm0, %v358_v40  ;;  %4996 = vst [vmem:[#allocation4_spill] sm:$0xff] %v4177_v36  ;;  %v372_v40 = vld [vmem:[%s3821_s30 + $0x190] sm:$0xff] }
  0x66   : > { %3244 = vmatprep.mubr.msk.f32.mxu0 %vm394_vm0, %v4083_v42 }
  0x68   : > { %3133 = vmatmul.mubr.msk.f32.gmra.mrb[36].mxu1 %vm394_vm0, %v359_v44  ;;  %v4181_v44 = vld [vmem:[%s3827_s8 + $0x190] sm:$0xff] }
  0x69   : > { %3245 = vmatmul.mubr.msk.f32.gmra.mrb[36].mxu0 %vm394_vm0, %v4093_v46  ;;  %3135 = vmatprep.mubr.msk.f32.mxu1 %vm394_vm0, %v360_v48  ;;  %4997 = vst [vmem:[#allocation5_spill] sm:$0xff] %v4181_v44  ;;  %v373_v48 = vld [vmem:[%s3821_s30 + $0x198] sm:$0xff] }
  0x6a   : > { %3247 = vmatprep.mubr.msk.f32.mxu0 %vm394_vm0, %v4097_v50 }
  0x6c   : > { %3136 = vmatmul.mubr.msk.f32.gmra.mrb[38].mxu1 %vm394_vm0, %v361_v52  ;;  %v4191_v52 = vld [vmem:[%s3827_s8 + $0x198] sm:$0xff] }
  0x6d   : > { %3248 = vmatmul.mubr.msk.f32.gmra.mrb[38].mxu0 %vm394_vm0, %v4107_v54  ;;  %3138 = vmatprep.mubr.msk.f32.mxu1 %vm394_vm0, %v362_v56  ;;  %4998 = vst [vmem:[#allocation6_spill] sm:$0xff] %v4191_v52  ;;  %v374_v56 = vld [vmem:[%s3821_s30 + $0x1a0] sm:$0xff] }
  0x6e   : > { %3250 = vmatprep.mubr.msk.f32.mxu0 %vm394_vm0, %v4111_v58 }
  0x70   : > { %3139 = vmatmul.mubr.msk.f32.gmra.mrb[40].mxu1 %vm394_vm0, %v363_v60  ;;  %v302_v60 = vld [vmem:[%s3827_s8 + $0x1a0] sm:$0xff] }
  0x71   : > { %3251 = vmatmul.mubr.msk.f32.gmra.mrb[40].mxu0 %vm394_vm0, %v4121_v62  ;;  %3141 = vmatprep.mubr.msk.f32.mxu1 %vm394_vm0, %v364_v0  ;;  %v375_v0 = vld [vmem:[%s3821_s30 + $0x1a8] sm:$0xff] }
  0x72   : > { %3253 = vmatprep.mubr.msk.f32.mxu0 %vm394_vm0, %v4125_v2 }
  0x74   : > { %3142 = vmatmul.mubr.msk.f32.gmra.mrb[42].mxu1 %vm394_vm0, %v365_v4  ;;  %v303_v4 = vld [vmem:[%s3827_s8 + $0x1a8] sm:$0xff] }
  0x75   : > { %3254 = vmatmul.mubr.msk.f32.gmra.mrb[42].mxu0 %vm394_vm0, %v4135_v6  ;;  %3144 = vmatprep.mubr.msk.f32.mxu1 %vm394_vm0, %v366_v8  ;;  %v376_v8 = vld [vmem:[%s3821_s30 + $0x1b0] sm:$0xff] }
  0x76   : > { %3256 = vmatprep.mubr.msk.f32.mxu0 %vm394_vm0, %v4139_v10 }
  0x78   : > { %3145 = vmatmul.mubr.msk.f32.gmra.mrb[44].mxu1 %vm394_vm0, %v367_v12  ;;  %v304_v12 = vld [vmem:[%s3827_s8 + $0x1b0] sm:$0xff] }
  0x79   : > { %3257 = vmatmul.mubr.msk.f32.gmra.mrb[44].mxu0 %vm394_vm0, %v4149_v14  ;;  %3147 = vmatprep.mubr.msk.f32.mxu1 %vm394_vm0, %v368_v16  ;;  %v377_v16 = vld [vmem:[%s3821_s30 + $0x1b8] sm:$0xff] }
  0x7a   : > { %3259 = vmatprep.mubr.msk.f32.mxu0 %vm394_vm0, %v4153_v18 }
  0x7c   : > { %3148 = vmatmul.mubr.msk.f32.gmra.mrb[46].mxu1 %vm394_vm0, %v369_v20  ;;  %v305_v20 = vld [vmem:[%s3827_s8 + $0x1b8] sm:$0xff] }
  0x7d   : > { %3260 = vmatmul.mubr.msk.f32.gmra.mrb[46].mxu0 %vm394_vm0, %v4163_v22  ;;  %3150 = vmatprep.mubr.msk.f32.mxu1 %vm394_vm0, %v370_v25  ;;  %v378_v25 = vld [vmem:[%s3821_s30 + $0x1c0] sm:$0xff] }
  0x7e   : > { %3262 = vmatprep.mubr.msk.f32.mxu0 %vm394_vm0, %v4167_v28 }
  0x80   : > { %3151 = vmatmul.mubr.msk.f32.gmra.mrb[48].mxu1 %vm394_vm0, %v371_v32  ;;  %v306_v32 = vld [vmem:[%s3827_s8 + $0x1c0] sm:$0xff] }
  0x81   : > { %3263 = vmatmul.mubr.msk.f32.gmra.mrb[48].mxu0 %vm394_vm0, %v4177_v36  ;;  %3153 = vmatprep.mubr.msk.f32.mxu1 %vm394_vm0, %v372_v40  ;;  %v379_v40 = vld [vmem:[%s3821_s30 + $0x1c8] sm:$0xff] }
  0x82   : > { %3265 = vmatprep.mubr.msk.f32.mxu0 %vm394_vm0, %v4181_v44 }
  0x84   : > { %3154 = vmatmul.mubr.msk.f32.gmra.mrb[50].mxu1 %vm394_vm0, %v373_v48  ;;  %v307_v48 = vld [vmem:[%s3827_s8 + $0x1c8] sm:$0xff] }
  0x85   : > { %3266 = vmatmul.mubr.msk.f32.gmra.mrb[50].mxu0 %vm394_vm0, %v4191_v52  ;;  %3156 = vmatprep.mubr.msk.f32.mxu1 %vm394_vm0, %v374_v56  ;;  %v380_v56 = vld [vmem:[%s3821_s30 + $0x1d0] sm:$0xff] }
  0x86   : > { %3268 = vmatprep.mubr.msk.f32.mxu0 %vm394_vm0, %v302_v60  ;;  %v308_v60 = vld [vmem:[%s3827_s8 + $0x1d0] sm:$0xff] }
  0x88   : > { %3157 = vmatmul.mubr.msk.f32.gmra.mrb[52].mxu1 %vm394_vm0, %v375_v0  ;;  %v381_v0 = vld [vmem:[%s3821_s30 + $0x1d8] sm:$0xff] }
  0x89   : > { %3269 = vmatmul.mubr.msk.f32.gmra.mrb[52].mxu0 %vm394_vm0, %v303_v4  ;;  %3159 = vmatprep.mubr.msk.f32.mxu1 %vm394_vm0, %v376_v8  ;;  %v309_v4 = vld [vmem:[%s3827_s8 + $0x1d8] sm:$0xff]  ;;  %v382_v8 = vld [vmem:[%s3821_s30 + $0x1e0] sm:$0xff] }
  0x8a   : > { %3271 = vmatprep.mubr.msk.f32.mxu0 %vm394_vm0, %v304_v12  ;;  %v310_v12 = vld [vmem:[%s3827_s8 + $0x1e0] sm:$0xff] }
  0x8c   : > { %3160 = vmatmul.mubr.msk.f32.gmra.mrb[54].mxu1 %vm394_vm0, %v377_v16  ;;  %v383_v16 = vld [vmem:[%s3821_s30 + $0x1e8] sm:$0xff] }
  0x8d   : > { %3272 = vmatmul.mubr.msk.f32.gmra.mrb[54].mxu0 %vm394_vm0, %v305_v20  ;;  %3162 = vmatprep.mubr.msk.f32.mxu1 %vm394_vm0, %v378_v25  ;;  %v311_v20 = vld [vmem:[%s3827_s8 + $0x1e8] sm:$0xff]  ;;  %v384_v25 = vld [vmem:[%s3821_s30 + $0x1f0] sm:$0xff] }
  0x8e   : > { %3274 = vmatprep.mubr.msk.f32.mxu0 %vm394_vm0, %v306_v32  ;;  %v312_v32 = vld [vmem:[%s3827_s8 + $0x1f0] sm:$0xff] }
  0x90   : > { %3163 = vmatmul.mubr.msk.f32.gmra.mrb[56].mxu1 %vm394_vm0, %v379_v40  ;;  %v385_v40 = vld [vmem:[%s3821_s30 + $0x1f8] sm:$0xff] }
  0x91   : > { %3275 = vmatmul.mubr.msk.f32.gmra.mrb[56].mxu0 %vm394_vm0, %v307_v48  ;;  %3165 = vmatprep.mubr.msk.f32.mxu1 %vm394_vm0, %v380_v56  ;;  %v313_v48 = vld [vmem:[%s3827_s8 + $0x1f8] sm:$0xff] }
  0x92   : > { %3277 = vmatprep.mubr.msk.f32.mxu0 %vm394_vm0, %v308_v60 }
  0x94   : > { %3166 = vmatmul.mubr.msk.f32.gmra.mrb[58].mxu1 %vm394_vm0, %v381_v0  ;;  %v4247_v0 = vld [vmem:[%s4966_s4] ss:$0 sm:$0xff] }
  0x95   : > { %3278 = vmatmul.mubr.msk.f32.gmra.mrb[58].mxu0 %vm394_vm0, %v309_v4  ;;  %3168 = vmatprep.mubr.msk.f32.mxu1 %vm394_vm0, %v382_v8 }
  0x96   : > { %3280 = vmatprep.mubr.msk.f32.mxu0 %vm394_vm0, %v310_v12 }
  0x98   : > { %3169 = vmatmul.mubr.msk.f32.gmra.mrb[60].mxu1 %vm394_vm0, %v383_v16 }
  0x99   : > { %3281 = vmatmul.mubr.msk.f32.gmra.mrb[60].mxu0 %vm394_vm0, %v311_v20  ;;  %3171 = vmatprep.mubr.msk.f32.mxu1 %vm394_vm0, %v384_v25 }
  0x9a   : > { %3283 = vmatprep.mubr.msk.f32.mxu0 %vm394_vm0, %v312_v32 }
  0x9c   : > { %3172 = vmatmul.mubr.msk.f32.gmra.mrb[62].mxu1 %vm394_vm0, %v385_v40 }
  0x9d   : > { %3284 = vmatmul.mubr.msk.f32.gmra.mrb[62].mxu0 %vm394_vm0, %v313_v48 }
  0xf3   : > { %v3080_v56 = vpop.f32.mrb[0].mxu1 }
  0xf4   : > { %v3192_v60 = vpop.f32.mrb[0].mxu0  ;;  %v653_v4 = vpop.f32.mrb[1].mxu1 }
  0xf5   : > { %v1236_v8 = vadd.f32 %v3192_v60, %v3080_v56  ;;  %v1230_v12 = vpop.f32.mrb[1].mxu0 }
  0xf6   : > { %v1231_v16 = vadd.f32 %v1230_v12, %v653_v4 }
  0xf7   : > { %v4250_v20 = vadd.f32 %v4247_v0, %v1236_v8  ;;  %v3083_v25 = vpop.f32.mrb[2].mxu1 }
  0xf8   : > { %v4253_v32 = vadd.f32 %v4247_v0, %v1231_v16  ;;  %v3195_v40 = vpop.f32.mrb[2].mxu0  ;;  %v663_v48 = vpop.f32.mrb[3].mxu1 }
  0xf9   : > { %4999 = vst [vmem:[#allocation7_spill] sm:$0xff] %v4250_v20  ;;  %3391 = vtanh.f32 %v4250_v20  ;;  %v1246_v52 = vadd.f32 %v3195_v40, %v3083_v25  ;;  %v1240_v44 = vpop.f32.mrb[3].mxu0 }
  0xfa   : > { %5000 = vst [vmem:[#allocation8_spill] sm:$0xff] %v4253_v32  ;;  %v1241_v36 = vadd.f32 %v1240_v44, %v663_v48  ;;  %3393 = vtanh.f32 %v4253_v32 }
  0xfb   : > { %v4258_v56 = vadd.f32 %v4247_v0, %v1246_v52  ;;  %v3086_v60 = vpop.f32.mrb[4].mxu1 }
  0xfc   : > { %v4261_v4 = vadd.f32 %v4247_v0, %v1241_v36  ;;  %v3198_v8 = vpop.f32.mrb[4].mxu0  ;;  %v673_v12 = vpop.f32.mrb[5].mxu1 }
  0xfd   : > { %5001 = vst [vmem:[#allocation9_spill] sm:$0xff] %v4258_v56  ;;  %3395 = vtanh.f32 %v4258_v56  ;;  %v1256_v16 = vadd.f32 %v3198_v8, %v3086_v60  ;;  %v1250_v28 = vpop.f32.mrb[5].mxu0 }
  0xfe   : > { %5002 = vst [vmem:[#allocation10_spill] sm:$0xff] %v4261_v4  ;;  %v1251_v22 = vadd.f32 %v1250_v28, %v673_v12  ;;  %3397 = vtanh.f32 %v4261_v4 }
  0xff   : > { %v4266_v44 = vadd.f32 %v4247_v0, %v1256_v16  ;;  %v3089_v25 = vpop.f32.mrb[6].mxu1 }
 0x100   : > { %v4269_v52 = vadd.f32 %v4247_v0, %v1251_v22  ;;  %v3201_v40 = vpop.f32.mrb[6].mxu0  ;;  %v683_v48 = vpop.f32.mrb[7].mxu1 }
 0x101   : > { %5003 = vst [vmem:[#allocation11_spill] sm:$0xff] %v4266_v44  ;;  %3399 = vtanh.f32 %v4266_v44  ;;  %v1266_v36 = vadd.f32 %v3201_v40, %v3089_v25  ;;  %v1260_v20 = vpop.f32.mrb[7].mxu0 }
 0x102   : > { %3401 = vtanh.f32 %v4269_v52  ;;  %v1261_v60 = vadd.f32 %v1260_v20, %v683_v48 }
 0x103   : > { %v3392_v8 = vpop.eup %3391  ;;  %v4274_v28 = vadd.f32 %v4247_v0, %v1266_v36  ;;  %v3092_v12 = vpop.f32.mrb[8].mxu1 }
 0x104   : > { %v4277_v16 = vadd.f32 %v4247_v0, %v1261_v60  ;;  %v3204_v56 = vpop.f32.mrb[8].mxu0  ;;  %v693_v22 = vpop.f32.mrb[9].mxu1  ;;  %v1941_v4 = vsub.f32 %v3392_v8, %v3841_v27 }
 0x105   : > { %5004 = vst [vmem:[#allocation12_spill] sm:$0xff] %v4274_v28  ;;  %v3394_v32 = vpop.eup %3393  ;;  %3403 = vtanh.f32 %v4274_v28  ;;  %v1276_v25 = vadd.f32 %v3204_v56, %v3092_v12  ;;  %v1270_v40 = vpop.f32.mrb[9].mxu0 }
 0x106   : > { %5005 = vst [vmem:[#allocation13_spill] sm:$0xff] %v4277_v16  ;;  %3405 = vtanh.f32 %v4277_v16  ;;  %v1271_v20 = vadd.f32 %v1270_v40, %v693_v22  ;;  %2070 = vrot.lane.b32.xlu0 %v1941_v4, %s3731_s13  ;;  %v1940_v56 = vsub.f32 %v3394_v32, %v3834_v23 }
 0x107   : > { %v3396_v48 = vpop.eup %3395  ;;  %v4284_v36 = vadd.f32 %v4247_v0, %v1276_v25  ;;  %v3095_v60 = vpop.f32.mrb[10].mxu1 }
 0x108   : > { %v4287_v44 = vadd.f32 %v4247_v0, %v1271_v20  ;;  %v3207_v27 = vpop.f32.mrb[10].mxu0  ;;  %v703_v8 = vpop.f32.mrb[11].mxu1  ;;  %v1943_v28 = vsub.f32 %v3396_v48, %v3855_v31 }
 0x109   : > { %v3398_v12 = vpop.eup %3397  ;;  %3407 = vtanh.f32 %v4284_v36  ;;  %v1286_v22 = vadd.f32 %v3207_v27, %v3095_v60  ;;  %v1280_v40 = vpop.f32.mrb[11].mxu0 }
 0x10a   : > { %3409 = vtanh.f32 %v4287_v44  ;;  %v1281_v4 = vadd.f32 %v1280_v40, %v703_v8  ;;  %2074 = vrot.lane.b32.xlu1 %v1943_v28, %s3731_s13  ;;  %2068 = vrot.lane.b32.xlu0 %v1940_v56, %s3731_s13  ;;  %v1942_v60 = vsub.f32 %v3398_v12, %v3845_v29 }
 0x10b   : > { %v3400_v25 = vpop.eup %3399  ;;  %v4296_v20 = vadd.f32 %v4247_v0, %v1286_v22  ;;  %v3098_v16 = vpop.f32.mrb[12].mxu1 }
 0x10c   : > { %v3402_v31 = vpop.eup %3401  ;;  %v4299_v23 = vadd.f32 %v4247_v0, %v1281_v4  ;;  %v3210_v32 = vpop.f32.mrb[12].mxu0  ;;  %v1945_v22 = vsub.f32 %v3400_v25, %v3869_v35 }
 0x10d   : > { %v713_v48 = vpop.f32.mrb[13].mxu1  ;;  %3411 = vtanh.f32 %v4296_v20  ;;  %v1296_v27 = vadd.f32 %v3210_v32, %v3098_v16  ;;  %v1290_v8 = vpop.f32.mrb[13].mxu0  ;;  %v1944_v28 = vsub.f32 %v3402_v31, %v3859_v33 }
 0x10e   : > { %3413 = vtanh.f32 %v4299_v23  ;;  %v1291_v56 = vadd.f32 %v1290_v8, %v713_v48  ;;  %2072 = vrot.lane.b32.xlu1 %v1942_v60, %s3731_s13 }
 0x10f   : > { %v3404_v40 = vpop.eup %3403  ;;  %v4308_v4 = vadd.f32 %v4247_v0, %v1296_v27  ;;  %2076 = vrot.lane.b32.xlu0 %v1944_v28, %s3731_s13  ;;  %v3101_v29 = vpop.f32.mrb[14].mxu1 }
 0x110   : > { %v3406_v12 = vpop.eup %3405  ;;  %v4312_v16 = vadd.f32 %v4247_v0, %v1291_v56  ;;  %v3213_v32 = vpop.f32.mrb[14].mxu0  ;;  %v1947_v25 = vsub.f32 %v3404_v40, %v3883_v39 }
 0x111   : > { %v723_v33 = vpop.f32.mrb[15].mxu1  ;;  %3415 = vtanh.f32 %v4308_v4  ;;  %v1306_v31 = vadd.f32 %v3213_v32, %v3101_v29  ;;  %v1300_v48 = vpop.f32.mrb[15].mxu0  ;;  %v1946_v60 = vsub.f32 %v3406_v12, %v3873_v37 }
 0x112   : > { %3417 = vtanh.f32 %v4312_v16  ;;  %v1301_v35 = vadd.f32 %v1300_v48, %v723_v33  ;;  %2078 = vrot.lane.b32.xlu1 %v1945_v22, %s3731_s13 }
 0x113   : > { %v3408_v27 = vpop.eup %3407  ;;  %v4320_v8 = vadd.f32 %v4247_v0, %v1306_v31  ;;  %2080 = vrot.lane.b32.xlu0 %v1946_v60, %s3731_s13  ;;  %v3104_v28 = vpop.f32.mrb[16].mxu1 }
 0x114   : > { %v3410_v56 = vpop.eup %3409  ;;  %v4324_v29 = vadd.f32 %v4247_v0, %v1301_v35  ;;  %v3216_v32 = vpop.f32.mrb[16].mxu0  ;;  %v1949_v40 = vsub.f32 %v3408_v27, %v3897_v43 }
 0x115   : > { %v733_v37 = vpop.f32.mrb[17].mxu1  ;;  %3419 = vtanh.f32 %v4320_v8  ;;  %v1316_v12 = vadd.f32 %v3216_v32, %v3104_v28  ;;  %v1310_v33 = vpop.f32.mrb[17].mxu0  ;;  %v1948_v22 = vsub.f32 %v3410_v56, %v3887_v41 }
 0x116   : > { %3421 = vtanh.f32 %v4324_v29  ;;  %v1311_v39 = vadd.f32 %v1310_v33, %v733_v37  ;;  %2082 = vrot.lane.b32.xlu1 %v1947_v25, %s3731_s13 }
 0x117   : > { %v3412_v31 = vpop.eup %3411  ;;  %v4332_v48 = vadd.f32 %v4247_v0, %v1316_v12  ;;  %2084 = vrot.lane.b32.xlu0 %v1948_v22, %s3731_s13  ;;  %v3107_v60 = vpop.f32.mrb[18].mxu1 }
 0x118   : > { %v3414_v35 = vpop.eup %3413  ;;  %v4336_v28 = vadd.f32 %v4247_v0, %v1311_v39  ;;  %v3219_v32 = vpop.f32.mrb[18].mxu0  ;;  %v1951_v27 = vsub.f32 %v3412_v31, %v3911_v47 }
 0x119   : > { %v743_v41 = vpop.f32.mrb[19].mxu1  ;;  %3423 = vtanh.f32 %v4332_v48  ;;  %v1326_v56 = vadd.f32 %v3219_v32, %v3107_v60  ;;  %v1320_v37 = vpop.f32.mrb[19].mxu0  ;;  %v1950_v25 = vsub.f32 %v3414_v35, %v3901_v45 }
 0x11a   : > { %3425 = vtanh.f32 %v4336_v28  ;;  %v1321_v43 = vadd.f32 %v1320_v37, %v743_v41  ;;  %2086 = vrot.lane.b32.xlu1 %v1949_v40, %s3731_s13 }
 0x11b   : > { %v3416_v12 = vpop.eup %3415  ;;  %v4344_v33 = vadd.f32 %v4247_v0, %v1326_v56  ;;  %2088 = vrot.lane.b32.xlu0 %v1950_v25, %s3731_s13  ;;  %v3110_v22 = vpop.f32.mrb[20].mxu1 }
 0x11c   : > { %v3418_v39 = vpop.eup %3417  ;;  %v4348_v60 = vadd.f32 %v4247_v0, %v1321_v43  ;;  %v3222_v32 = vpop.f32.mrb[20].mxu0  ;;  %v1953_v31 = vsub.f32 %v3416_v12, %v3925_v51 }
 0x11d   : > { %v753_v45 = vpop.f32.mrb[21].mxu1  ;;  %3427 = vtanh.f32 %v4344_v33  ;;  %v1336_v35 = vadd.f32 %v3222_v32, %v3110_v22  ;;  %v1330_v41 = vpop.f32.mrb[21].mxu0  ;;  %v1952_v40 = vsub.f32 %v3418_v39, %v3915_v49 }
 0x11e   : > { %3429 = vtanh.f32 %v4348_v60  ;;  %v1331_v47 = vadd.f32 %v1330_v41, %v753_v45  ;;  %2090 = vrot.lane.b32.xlu1 %v1951_v27, %s3731_s13 }
 0x11f   : > { %v3420_v56 = vpop.eup %3419  ;;  %v4356_v37 = vadd.f32 %v4247_v0, %v1336_v35  ;;  %2092 = vrot.lane.b32.xlu0 %v1952_v40, %s3731_s13  ;;  %v3113_v25 = vpop.f32.mrb[22].mxu1 }
 0x120   : > { %v3422_v43 = vpop.eup %3421  ;;  %v4360_v22 = vadd.f32 %v4247_v0, %v1331_v47  ;;  %v3225_v32 = vpop.f32.mrb[22].mxu0  ;;  %v1955_v12 = vsub.f32 %v3420_v56, %v3939_v55 }
 0x121   : > { %v763_v49 = vpop.f32.mrb[23].mxu1  ;;  %3431 = vtanh.f32 %v4356_v37  ;;  %v1346_v39 = vadd.f32 %v3225_v32, %v3113_v25  ;;  %v1340_v45 = vpop.f32.mrb[23].mxu0  ;;  %v1954_v27 = vsub.f32 %v3422_v43, %v3929_v53 }
 0x122   : > { %3433 = vtanh.f32 %v4360_v22  ;;  %v1341_v51 = vadd.f32 %v1340_v45, %v763_v49  ;;  %2094 = vrot.lane.b32.xlu1 %v1953_v31, %s3731_s13 }
 0x123   : > { %v3424_v35 = vpop.eup %3423  ;;  %v4368_v41 = vadd.f32 %v4247_v0, %v1346_v39  ;;  %2096 = vrot.lane.b32.xlu0 %v1954_v27, %s3731_s13  ;;  %v3116_v40 = vpop.f32.mrb[24].mxu1 }
 0x124   : > { %v3426_v47 = vpop.eup %3425  ;;  %v4372_v25 = vadd.f32 %v4247_v0, %v1341_v51  ;;  %v3228_v32 = vpop.f32.mrb[24].mxu0  ;;  %v1957_v56 = vsub.f32 %v3424_v35, %v3953_v59 }
 0x125   : > { %v773_v53 = vpop.f32.mrb[25].mxu1  ;;  %3435 = vtanh.f32 %v4368_v41  ;;  %v1356_v43 = vadd.f32 %v3228_v32, %v3116_v40  ;;  %v1350_v49 = vpop.f32.mrb[25].mxu0  ;;  %v1956_v31 = vsub.f32 %v3426_v47, %v3943_v57 }
 0x126   : > { %3437 = vtanh.f32 %v4372_v25  ;;  %v1351_v55 = vadd.f32 %v1350_v49, %v773_v53  ;;  %2098 = vrot.lane.b32.xlu1 %v1955_v12, %s3731_s13 }
 0x127   : > { %v3428_v39 = vpop.eup %3427  ;;  %v4380_v45 = vadd.f32 %v4247_v0, %v1356_v43  ;;  %2100 = vrot.lane.b32.xlu0 %v1956_v31, %s3731_s13  ;;  %v3119_v27 = vpop.f32.mrb[26].mxu1 }
 0x128   : > { %v3430_v51 = vpop.eup %3429  ;;  %v4384_v40 = vadd.f32 %v4247_v0, %v1351_v55  ;;  %v3231_v32 = vpop.f32.mrb[26].mxu0  ;;  %v1959_v35 = vsub.f32 %v3428_v39, %v3967_v63 }
 0x129   : > { %v783_v57 = vpop.f32.mrb[27].mxu1  ;;  %3439 = vtanh.f32 %v4380_v45  ;;  %v1366_v47 = vadd.f32 %v3231_v32, %v3119_v27  ;;  %v1360_v53 = vpop.f32.mrb[27].mxu0  ;;  %v1958_v12 = vsub.f32 %v3430_v51, %v3957_v61 }
 0x12a   : > { %3441 = vtanh.f32 %v4384_v40  ;;  %v1361_v59 = vadd.f32 %v1360_v53, %v783_v57  ;;  %2102 = vrot.lane.b32.xlu1 %v1957_v56, %s3731_s13 }
 0x12b   : > { %v3432_v43 = vpop.eup %3431  ;;  %v4392_v49 = vadd.f32 %v4247_v0, %v1366_v47  ;;  %2104 = vrot.lane.b32.xlu0 %v1958_v12, %s3731_s13  ;;  %v3122_v31 = vpop.f32.mrb[28].mxu1 }
 0x12c   : > { %v3434_v55 = vpop.eup %3433  ;;  %v4396_v27 = vadd.f32 %v4247_v0, %v1361_v59  ;;  %v3234_v32 = vpop.f32.mrb[28].mxu0  ;;  %v1961_v39 = vsub.f32 %v3432_v43, %v3981_v3 }
 0x12d   : > { %v793_v61 = vpop.f32.mrb[29].mxu1  ;;  %3443 = vtanh.f32 %v4392_v49  ;;  %v1376_v51 = vadd.f32 %v3234_v32, %v3122_v31  ;;  %v1370_v57 = vpop.f32.mrb[29].mxu0  ;;  %v1960_v56 = vsub.f32 %v3434_v55, %v3971_v1 }
 0x12e   : > { %3445 = vtanh.f32 %v4396_v27  ;;  %v1371_v63 = vadd.f32 %v1370_v57, %v793_v61  ;;  %2106 = vrot.lane.b32.xlu1 %v1959_v35, %s3731_s13 }
 0x12f   : > { %v3436_v47 = vpop.eup %3435  ;;  %v4404_v53 = vadd.f32 %v4247_v0, %v1376_v51  ;;  %2108 = vrot.lane.b32.xlu0 %v1960_v56, %s3731_s13  ;;  %v3125_v12 = vpop.f32.mrb[30].mxu1 }
 0x130   : > { %v3438_v59 = vpop.eup %3437  ;;  %v4408_v31 = vadd.f32 %v4247_v0, %v1371_v63  ;;  %v3237_v32 = vpop.f32.mrb[30].mxu0  ;;  %v1963_v43 = vsub.f32 %v3436_v47, %v3995_v7 }
 0x131   : > { %v803_v1 = vpop.f32.mrb[31].mxu1  ;;  %3447 = vtanh.f32 %v4404_v53  ;;  %v1386_v55 = vadd.f32 %v3237_v32, %v3125_v12  ;;  %v1380_v61 = vpop.f32.mrb[31].mxu0  ;;  %v1962_v35 = vsub.f32 %v3438_v59, %v3985_v5 }
 0x132   : > { %3449 = vtanh.f32 %v4408_v31  ;;  %v1381_v3 = vadd.f32 %v1380_v61, %v803_v1  ;;  %2110 = vrot.lane.b32.xlu1 %v1961_v39, %s3731_s13 }
 0x133   : > { %v3440_v51 = vpop.eup %3439  ;;  %v4416_v57 = vadd.f32 %v4247_v0, %v1386_v55  ;;  %2112 = vrot.lane.b32.xlu0 %v1962_v35, %s3731_s13  ;;  %v3128_v56 = vpop.f32.mrb[32].mxu1 }
 0x134   : > { %v3442_v63 = vpop.eup %3441  ;;  %v4420_v12 = vadd.f32 %v4247_v0, %v1381_v3  ;;  %v3240_v32 = vpop.f32.mrb[32].mxu0  ;;  %v1965_v47 = vsub.f32 %v3440_v51, %v4009_v11 }
 0x135   : > { %v813_v5 = vpop.f32.mrb[33].mxu1  ;;  %3451 = vtanh.f32 %v4416_v57  ;;  %v1396_v59 = vadd.f32 %v3240_v32, %v3128_v56  ;;  %v1390_v1 = vpop.f32.mrb[33].mxu0  ;;  %v1964_v39 = vsub.f32 %v3442_v63, %v3999_v9 }
 0x136   : > { %3453 = vtanh.f32 %v4420_v12  ;;  %v1391_v7 = vadd.f32 %v1390_v1, %v813_v5  ;;  %2114 = vrot.lane.b32.xlu1 %v1963_v43, %s3731_s13 }
 0x137   : > { %v3444_v55 = vpop.eup %3443  ;;  %v4428_v61 = vadd.f32 %v4247_v0, %v1396_v59  ;;  %2116 = vrot.lane.b32.xlu0 %v1964_v39, %s3731_s13  ;;  %v3131_v35 = vpop.f32.mrb[34].mxu1 }
 0x138   : > { %v3446_v3 = vpop.eup %3445  ;;  %v4432_v56 = vadd.f32 %v4247_v0, %v1391_v7  ;;  %v3243_v32 = vpop.f32.mrb[34].mxu0  ;;  %v1967_v51 = vsub.f32 %v3444_v55, %v4023_v15 }
 0x139   : > { %v823_v9 = vpop.f32.mrb[35].mxu1  ;;  %3455 = vtanh.f32 %v4428_v61  ;;  %v1406_v63 = vadd.f32 %v3243_v32, %v3131_v35  ;;  %v1400_v5 = vpop.f32.mrb[35].mxu0  ;;  %v1966_v43 = vsub.f32 %v3446_v3, %v4013_v13 }
 0x13a   : > { %3457 = vtanh.f32 %v4432_v56  ;;  %v1401_v11 = vadd.f32 %v1400_v5, %v823_v9  ;;  %2118 = vrot.lane.b32.xlu1 %v1965_v47, %s3731_s13 }
 0x13b   : > { %v3448_v59 = vpop.eup %3447  ;;  %v4440_v1 = vadd.f32 %v4247_v0, %v1406_v63  ;;  %2120 = vrot.lane.b32.xlu0 %v1966_v43, %s3731_s13  ;;  %v3134_v39 = vpop.f32.mrb[36].mxu1 }
 0x13c   : > { %v3450_v7 = vpop.eup %3449  ;;  %v4444_v35 = vadd.f32 %v4247_v0, %v1401_v11  ;;  %v3246_v32 = vpop.f32.mrb[36].mxu0  ;;  %v1969_v55 = vsub.f32 %v3448_v59, %v4037_v19 }
 0x13d   : > { %v833_v13 = vpop.f32.mrb[37].mxu1  ;;  %3459 = vtanh.f32 %v4440_v1  ;;  %v1416_v3 = vadd.f32 %v3246_v32, %v3134_v39  ;;  %v1410_v9 = vpop.f32.mrb[37].mxu0  ;;  %v1968_v47 = vsub.f32 %v3450_v7, %v4027_v17 }
 0x13e   : > { %3461 = vtanh.f32 %v4444_v35  ;;  %v1411_v15 = vadd.f32 %v1410_v9, %v833_v13  ;;  %2122 = vrot.lane.b32.xlu1 %v1967_v51, %s3731_s13 }
 0x13f   : > { %v3452_v63 = vpop.eup %3451  ;;  %v4452_v5 = vadd.f32 %v4247_v0, %v1416_v3  ;;  %2124 = vrot.lane.b32.xlu0 %v1968_v47, %s3731_s13  ;;  %v3137_v43 = vpop.f32.mrb[38].mxu1 }
 0x140   : > { %v3454_v11 = vpop.eup %3453  ;;  %v4456_v39 = vadd.f32 %v4247_v0, %v1411_v15  ;;  %v3249_v32 = vpop.f32.mrb[38].mxu0  ;;  %v1971_v59 = vsub.f32 %v3452_v63, %v4051_v24 }
 0x141   : > { %v843_v17 = vpop.f32.mrb[39].mxu1  ;;  %3463 = vtanh.f32 %v4452_v5  ;;  %v1426_v7 = vadd.f32 %v3249_v32, %v3137_v43  ;;  %v1420_v13 = vpop.f32.mrb[39].mxu0  ;;  %v1970_v51 = vsub.f32 %v3454_v11, %v4041_v21 }
 0x142   : > { %3465 = vtanh.f32 %v4456_v39  ;;  %v1421_v19 = vadd.f32 %v1420_v13, %v843_v17  ;;  %2126 = vrot.lane.b32.xlu1 %v1969_v55, %s3731_s13 }
 0x143   : > { %v3456_v3 = vpop.eup %3455  ;;  %v4464_v9 = vadd.f32 %v4247_v0, %v1426_v7  ;;  %2128 = vrot.lane.b32.xlu0 %v1970_v51, %s3731_s13  ;;  %v3140_v47 = vpop.f32.mrb[40].mxu1 }
 0x144   : > { %v3458_v15 = vpop.eup %3457  ;;  %v4468_v43 = vadd.f32 %v4247_v0, %v1421_v19  ;;  %v3252_v32 = vpop.f32.mrb[40].mxu0  ;;  %v1973_v63 = vsub.f32 %v3456_v3, %v4065_v30 }
 0x145   : > { %v853_v21 = vpop.f32.mrb[41].mxu1  ;;  %3467 = vtanh.f32 %v4464_v9  ;;  %v1436_v11 = vadd.f32 %v3252_v32, %v3140_v47  ;;  %v1430_v17 = vpop.f32.mrb[41].mxu0  ;;  %v1972_v55 = vsub.f32 %v3458_v15, %v4055_v26 }
 0x146   : > { %3469 = vtanh.f32 %v4468_v43  ;;  %v1431_v24 = vadd.f32 %v1430_v17, %v853_v21  ;;  %2130 = vrot.lane.b32.xlu1 %v1971_v59, %s3731_s13 }
 0x147   : > { %v3460_v7 = vpop.eup %3459  ;;  %v4476_v13 = vadd.f32 %v4247_v0, %v1436_v11  ;;  %2132 = vrot.lane.b32.xlu0 %v1972_v55, %s3731_s13  ;;  %v3143_v51 = vpop.f32.mrb[42].mxu1 }
 0x148   : > { %v3462_v19 = vpop.eup %3461  ;;  %v4480_v47 = vadd.f32 %v4247_v0, %v1431_v24  ;;  %v3255_v32 = vpop.f32.mrb[42].mxu0  ;;  %v1975_v3 = vsub.f32 %v3460_v7, %v4079_v38 }
 0x149   : > { %v863_v26 = vpop.f32.mrb[43].mxu1  ;;  %3471 = vtanh.f32 %v4476_v13  ;;  %v1446_v15 = vadd.f32 %v3255_v32, %v3143_v51  ;;  %v1440_v21 = vpop.f32.mrb[43].mxu0  ;;  %v1974_v59 = vsub.f32 %v3462_v19, %v4069_v34 }
 0x14a   : > { %3473 = vtanh.f32 %v4480_v47  ;;  %v1441_v30 = vadd.f32 %v1440_v21, %v863_v26  ;;  %2134 = vrot.lane.b32.xlu1 %v1973_v63, %s3731_s13 }
 0x14b   : > { %v3464_v11 = vpop.eup %3463  ;;  %v4488_v17 = vadd.f32 %v4247_v0, %v1446_v15  ;;  %2136 = vrot.lane.b32.xlu0 %v1974_v59, %s3731_s13  ;;  %v3146_v55 = vpop.f32.mrb[44].mxu1 }
 0x14c   : > { %v3466_v24 = vpop.eup %3465  ;;  %v4492_v51 = vadd.f32 %v4247_v0, %v1441_v30  ;;  %v3258_v32 = vpop.f32.mrb[44].mxu0  ;;  %v1977_v7 = vsub.f32 %v3464_v11, %v4093_v46 }
 0x14d   : > { %v873_v34 = vpop.f32.mrb[45].mxu1  ;;  %3475 = vtanh.f32 %v4488_v17  ;;  %v1456_v19 = vadd.f32 %v3258_v32, %v3146_v55  ;;  %v1450_v26 = vpop.f32.mrb[45].mxu0  ;;  %v1976_v63 = vsub.f32 %v3466_v24, %v4083_v42 }
 0x14e   : > { %3477 = vtanh.f32 %v4492_v51  ;;  %v1451_v38 = vadd.f32 %v1450_v26, %v873_v34  ;;  %2138 = vrot.lane.b32.xlu1 %v1975_v3, %s3731_s13 }
 0x14f   : > { %v3468_v15 = vpop.eup %3467  ;;  %v4500_v21 = vadd.f32 %v4247_v0, %v1456_v19  ;;  %2140 = vrot.lane.b32.xlu0 %v1976_v63, %s3731_s13  ;;  %v3149_v59 = vpop.f32.mrb[46].mxu1 }
 0x150   : > { %v3470_v30 = vpop.eup %3469  ;;  %v4504_v55 = vadd.f32 %v4247_v0, %v1451_v38  ;;  %v3261_v32 = vpop.f32.mrb[46].mxu0  ;;  %v1979_v11 = vsub.f32 %v3468_v15, %v4107_v54 }
 0x151   : > { %v883_v42 = vpop.f32.mrb[47].mxu1  ;;  %3479 = vtanh.f32 %v4500_v21  ;;  %v1466_v24 = vadd.f32 %v3261_v32, %v3149_v59  ;;  %v1460_v34 = vpop.f32.mrb[47].mxu0  ;;  %v1978_v3 = vsub.f32 %v3470_v30, %v4097_v50 }
 0x152   : > { %3481 = vtanh.f32 %v4504_v55  ;;  %v1461_v46 = vadd.f32 %v1460_v34, %v883_v42  ;;  %2142 = vrot.lane.b32.xlu1 %v1977_v7, %s3731_s13 }
 0x153   : > { %v3472_v19 = vpop.eup %3471  ;;  %v4512_v26 = vadd.f32 %v4247_v0, %v1466_v24  ;;  %2144 = vrot.lane.b32.xlu0 %v1978_v3, %s3731_s13  ;;  %v3152_v63 = vpop.f32.mrb[48].mxu1 }
 0x154   : > { %v3474_v38 = vpop.eup %3473  ;;  %v4516_v59 = vadd.f32 %v4247_v0, %v1461_v46  ;;  %v3264_v32 = vpop.f32.mrb[48].mxu0  ;;  %v1981_v15 = vsub.f32 %v3472_v19, %v4121_v62 }
 0x155   : > { %v893_v50 = vpop.f32.mrb[49].mxu1  ;;  %3483 = vtanh.f32 %v4512_v26  ;;  %v1476_v30 = vadd.f32 %v3264_v32, %v3152_v63  ;;  %v1470_v42 = vpop.f32.mrb[49].mxu0  ;;  %v1980_v7 = vsub.f32 %v3474_v38, %v4111_v58 }
 0x156   : > { %3485 = vtanh.f32 %v4516_v59  ;;  %v1471_v54 = vadd.f32 %v1470_v42, %v893_v50  ;;  %2146 = vrot.lane.b32.xlu1 %v1979_v11, %s3731_s13 }
 0x157   : > { %v3476_v24 = vpop.eup %3475  ;;  %v4524_v34 = vadd.f32 %v4247_v0, %v1476_v30  ;;  %2148 = vrot.lane.b32.xlu0 %v1980_v7, %s3731_s13  ;;  %v3155_v3 = vpop.f32.mrb[50].mxu1 }
 0x158   : > { %v3478_v46 = vpop.eup %3477  ;;  %v4528_v63 = vadd.f32 %v4247_v0, %v1471_v54  ;;  %v3267_v32 = vpop.f32.mrb[50].mxu0  ;;  %v1983_v19 = vsub.f32 %v3476_v24, %v4135_v6 }
 0x159   : > { %v903_v58 = vpop.f32.mrb[51].mxu1  ;;  %3487 = vtanh.f32 %v4524_v34  ;;  %v1486_v38 = vadd.f32 %v3267_v32, %v3155_v3  ;;  %v1480_v50 = vpop.f32.mrb[51].mxu0  ;;  %v1982_v11 = vsub.f32 %v3478_v46, %v4125_v2 }
 0x15a   : > { %3489 = vtanh.f32 %v4528_v63  ;;  %v1481_v62 = vadd.f32 %v1480_v50, %v903_v58  ;;  %2150 = vrot.lane.b32.xlu1 %v1981_v15, %s3731_s13 }
 0x15b   : > { %v3480_v30 = vpop.eup %3479  ;;  %v4536_v42 = vadd.f32 %v4247_v0, %v1486_v38  ;;  %2152 = vrot.lane.b32.xlu0 %v1982_v11, %s3731_s13  ;;  %v3158_v7 = vpop.f32.mrb[52].mxu1 }
 0x15c   : > { %v3482_v54 = vpop.eup %3481  ;;  %v4540_v3 = vadd.f32 %v4247_v0, %v1481_v62  ;;  %v3270_v32 = vpop.f32.mrb[52].mxu0  ;;  %v1985_v24 = vsub.f32 %v3480_v30, %v4149_v14  ;;  %v5010_v30 = vld [vmem:[#allocation2_spill] sm:$0xff] }
 0x15d   : > { %5006 = vst [vmem:[#allocation14_spill] sm:$0xff] %v4536_v42  ;;  %v913_v2 = vpop.f32.mrb[53].mxu1  ;;  %3491 = vtanh.f32 %v4536_v42  ;;  %v1496_v46 = vadd.f32 %v3270_v32, %v3158_v7  ;;  %v1490_v58 = vpop.f32.mrb[53].mxu0  ;;  %v1984_v15 = vsub.f32 %v3482_v54, %v4139_v10 }
 0x15e   : > { %5007 = vst [vmem:[#allocation15_spill] sm:$0xff] %v4540_v3  ;;  %3493 = vtanh.f32 %v4540_v3  ;;  %v1491_v6 = vadd.f32 %v1490_v58, %v913_v2  ;;  %2154 = vrot.lane.b32.xlu1 %v1983_v19, %s3731_s13 }
 0x15f   : > { %v3484_v38 = vpop.eup %3483  ;;  %v4548_v50 = vadd.f32 %v4247_v0, %v1496_v46  ;;  %2156 = vrot.lane.b32.xlu0 %v1984_v15, %s3731_s13  ;;  %v3161_v11 = vpop.f32.mrb[54].mxu1 }
 0x160   : > { %v3486_v62 = vpop.eup %3485  ;;  %v4552_v7 = vadd.f32 %v4247_v0, %v1491_v6  ;;  %v3273_v32 = vpop.f32.mrb[54].mxu0  ;;  %v1987_v46 = vsub.f32 %v3484_v38, %v5010_v30  ;;  %v5014_v38 = vld [vmem:[#allocation3_spill] sm:$0xff] }
 0x161   : > { %5008 = vst [vmem:[#allocation16_spill] sm:$0xff] %v4548_v50  ;;  %v923_v10 = vpop.f32.mrb[55].mxu1  ;;  %3495 = vtanh.f32 %v4548_v50  ;;  %v1506_v54 = vadd.f32 %v3273_v32, %v3161_v11  ;;  %v1500_v2 = vpop.f32.mrb[55].mxu0  ;;  %v1986_v19 = vsub.f32 %v3486_v62, %v4153_v18  ;;  %v5012_v50 = vld [vmem:[#allocation8_spill] sm:$0xff] }
 0x162   : > { %5009 = vst [vmem:[#allocation17_spill] sm:$0xff] %v4552_v7  ;;  %3497 = vtanh.f32 %v4552_v7  ;;  %v1501_v14 = vadd.f32 %v1500_v2, %v923_v10  ;;  %2158 = vrot.lane.b32.xlu1 %v1985_v24, %s3731_s13  ;;  %v1684_v11 = vmul.f32 0.5, %v5012_v50 }
 0x163   : > { %v3488_v58 = vpop.eup %3487  ;;  %v4560_v15 = vadd.f32 %v4247_v0, %v1506_v54  ;;  %2160 = vrot.lane.b32.xlu0 %v1986_v19, %s3731_s13  ;;  %v3164_v6 = vpop.f32.mrb[56].mxu1  ;;  %v5015_v19 = vld [vmem:[#allocation4_spill] sm:$0xff] }
 0x164   : > { %v3490_v42 = vpop.eup %3489  ;;  %v4565_v32 = vadd.f32 %v4247_v0, %v1501_v14  ;;  %v3276_v18 = vpop.f32.mrb[56].mxu0  ;;  %v1989_v30 = vsub.f32 %v3488_v58, %v5015_v19 }
 0x165   : > { %5011 = vst [vmem:[#allocation2_spill] sm:$0xff] %v4560_v15  ;;  %v933_v62 = vpop.f32.mrb[57].mxu1  ;;  %3499 = vtanh.f32 %v4560_v15  ;;  %v1516_v24 = vadd.f32 %v3276_v18, %v3164_v6  ;;  %v1510_v10 = vpop.f32.mrb[57].mxu0  ;;  %v1988_v2 = vsub.f32 %v3490_v42, %v5014_v38  ;;  %v5017_v15 = vld [vmem:[#allocation7_spill] sm:$0xff] }
 0x166   : > { %5013 = vst [vmem:[#allocation8_spill] sm:$0xff] %v4565_v32  ;;  %3501 = vtanh.f32 %v4565_v32  ;;  %v1511_v54 = vadd.f32 %v1510_v10, %v933_v62  ;;  %2162 = vrot.lane.b32.xlu1 %v1987_v46, %s3731_s13  ;;  %v1685_v6 = vmul.f32 0.5, %v5017_v15  ;;  %v5019_v10 = vld [vmem:[#allocation5_spill] sm:$0xff] }
 0x167   : > { %v3492_v7 = vpop.eup %3491  ;;  %v4573_v50 = vadd.f32 %v4247_v0, %v1516_v24  ;;  %2164 = vrot.lane.b32.xlu0 %v1988_v2, %s3731_s13  ;;  %v3167_v14 = vpop.f32.mrb[58].mxu1  ;;  %3503 = vtanh.f32 %v1684_v11  ;;  %v5020_v2 = vld [vmem:[#allocation6_spill] sm:$0xff]  ;;  %v5024_v32 = vld [vmem:[#allocation9_spill] sm:$0xff] }
 0x168   : > { %v3494_v3 = vpop.eup %3493  ;;  %v4578_v42 = vadd.f32 %v4247_v0, %v1511_v54  ;;  %v3279_v18 = vpop.f32.mrb[58].mxu0  ;;  %v1991_v15 = vsub.f32 %v3492_v7, %v5020_v2  ;;  %v3647_v7 = vld [vmem:[%s3827_s8 + $0x1a0] sm:$0xff] }
 0x169   : > { %5016 = vst [vmem:[#allocation3_spill] sm:$0xff] %v4573_v50  ;;  %v943_v62 = vpop.f32.mrb[59].mxu1  ;;  %3505 = vtanh.f32 %v4573_v50  ;;  %v1526_v46 = vadd.f32 %v3279_v18, %v3167_v14  ;;  %v1520_v58 = vpop.f32.mrb[59].mxu0  ;;  %v1990_v38 = vsub.f32 %v3494_v3, %v5019_v10 }
 0x16a   : > { %5018 = vst [vmem:[#allocation4_spill] sm:$0xff] %v4578_v42  ;;  %3507 = vtanh.f32 %v4578_v42  ;;  %v1521_v24 = vadd.f32 %v1520_v58, %v943_v62  ;;  %2166 = vrot.lane.b32.xlu1 %v1989_v30, %s3731_s13  ;;  %v5023_v62 = vld [vmem:[#allocation10_spill] sm:$0xff] }
 0x16b   : > { %v3496_v11 = vpop.eup %3495  ;;  %v4586_v54 = vadd.f32 %v4247_v0, %v1526_v46  ;;  %2168 = vrot.lane.b32.xlu0 %v1990_v38, %s3731_s13  ;;  %v3170_v19 = vpop.f32.mrb[60].mxu1  ;;  %3509 = vtanh.f32 %v1685_v6  ;;  %v1686_v58 = vmul.f32 0.5, %v5023_v62  ;;  %v3648_v6 = vld [vmem:[%s3827_s8 + $0x1a8] sm:$0xff] }
 0x16c   : > { %v3498_v14 = vpop.eup %3497  ;;  %v4590_v3 = vadd.f32 %v4247_v0, %v1521_v24  ;;  %v3282_v18 = vpop.f32.mrb[60].mxu0  ;;  %v1993_v50 = vsub.f32 %v3496_v11, %v3648_v6 }
 0x16d   : > { %5021 = vst [vmem:[#allocation7_spill] sm:$0xff] %v4586_v54  ;;  %v953_v10 = vpop.f32.mrb[61].mxu1  ;;  %3511 = vtanh.f32 %v4586_v54  ;;  %v1992_v30 = vsub.f32 %v3498_v14, %v3647_v7  ;;  %v1536_v2 = vadd.f32 %v3282_v18, %v3170_v19  ;;  %v1530_v46 = vpop.f32.mrb[61].mxu0  ;;  %v1687_v54 = vmul.f32 0.5, %v5024_v32  ;;  %v3650_v32 = vld [vmem:[%s3827_s8 + $0x1b8] sm:$0xff] }
 0x16e   : > { %5022 = vst [vmem:[#allocation5_spill] sm:$0xff] %v4590_v3  ;;  %3513 = vtanh.f32 %v4590_v3  ;;  %2170 = vrot.lane.b32.xlu1 %v1991_v15, %s3731_s13  ;;  %v1531_v38 = vadd.f32 %v1530_v46, %v953_v10  ;;  %v3649_v15 = vld [vmem:[%s3827_s8 + $0x1b0] sm:$0xff] }
 0x16f   : > { %v3500_v24 = vpop.eup %3499  ;;  %2172 = vrot.lane.b32.xlu0 %v1992_v30, %s3731_s13  ;;  %v3173_v42 = vpop.f32.mrb[62].mxu1  ;;  %3515 = vtanh.f32 %v1686_v58  ;;  %v4604_v7 = vadd.f32 %v4247_v0, %v1536_v2  ;;  %v1688_v2 = vmul.f32 0.5, %v4269_v52  ;;  %v5028_v52 = vld [vmem:[#allocation11_spill] sm:$0xff] }
 0x170   : > { %v3502_v62 = vpop.eup %3501  ;;  %v4601_v14 = vadd.f32 %v4247_v0, %v1531_v38  ;;  %v3285_v19 = vpop.f32.mrb[62].mxu0  ;;  %v1995_v38 = vsub.f32 %v3500_v24, %v3650_v32  ;;  %v3652_v24 = vld [vmem:[%s3827_s8 + $0x1c8] sm:$0xff] }
 0x171   : > { %v963_v18 = vpop.f32.mrb[63].mxu1  ;;  %5026 = vst [vmem:[#allocation10_spill] sm:$0xff] %v4604_v7  ;;  %v1994_v11 = vsub.f32 %v3502_v62, %v3649_v15  ;;  %v1546_v10 = vadd.f32 %v3285_v19, %v3173_v42  ;;  %v1540_v46 = vpop.f32.mrb[63].mxu0  ;;  %v3651_v42 = vld [vmem:[%s3827_s8 + $0x1c0] sm:$0xff] }
 0x172   : > { %5025 = vst [vmem:[#allocation6_spill] sm:$0xff] %v4601_v14  ;;  %v3504_v30 = vpop.eup %3503  ;;  %3517 = vtanh.f32 %v4601_v14  ;;  %2174 = vrot.lane.b32.xlu1 %v1993_v50, %s3731_s13  ;;  %v1541_v6 = vadd.f32 %v1540_v46, %v963_v18  ;;  %v1689_v46 = vmul.f32 0.5, %v5028_v52  ;;  %v5031_v52 = vld [vmem:[#allocation12_spill] sm:$0xff] }
 0x173   : > { %v3506_v3 = vpop.eup %3505  ;;  %2176 = vrot.lane.b32.xlu0 %v1994_v11, %s3731_s13  ;;  %3519 = vtanh.f32 %v1687_v54  ;;  %v1812_v54 = vmul.f32 0.5, %v3504_v30 }
 0x174   : > { %v3508_v58 = vpop.eup %3507  ;;  %3521 = vtanh.f32 %v4604_v7  ;;  %v4616_v50 = vadd.f32 %v4247_v0, %v1541_v6  ;;  %v1997_v18 = vsub.f32 %v3506_v3, %v3652_v24  ;;  %v5030_v7 = vld [vmem:[#allocation13_spill] sm:$0xff] }
 0x175   : > { %v1996_v62 = vsub.f32 %v3508_v58, %v3651_v42  ;;  %v3510_v19 = vpop.eup %3509  ;;  %3523 = vtanh.f32 %v1688_v2  ;;  %v4622_v58 = vadd.f32 %v4247_v0, %v1546_v10  ;;  %v3653_v42 = vld [vmem:[%s3827_s8 + $0x1d0] sm:$0xff]  ;;  %v1690_v6 = vmul.f32 0.5, %v5030_v7  ;;  %v3654_v3 = vld [vmem:[%s3827_s8 + $0x1d8] sm:$0xff] }
 0x176   : > { %2178 = vrot.lane.b32.xlu1 %v1995_v38, %s3731_s13  ;;  %5027 = vst [vmem:[#allocation9_spill] sm:$0xff] %v4616_v50  ;;  %v1813_v14 = vmul.f32 0.5, %v3510_v19  ;;  %3525 = vtanh.f32 %v4616_v50  ;;  %v1876_v24 = vadd.f32 0.5, %v1812_v54 }
 0x177   : > { %v3512_v15 = vpop.eup %3511  ;;  %2180 = vrot.lane.b32.xlu0 %v1996_v62, %s3731_s13  ;;  %5029 = vst [vmem:[#allocation11_spill] sm:$0xff] %v4622_v58  ;;  %3527 = vtanh.f32 %v1689_v46  ;;  %v3655_v46 = vld [vmem:[%s3827_s8 + $0x1e0] sm:$0xff] }
 0x178   : > { %v3514_v11 = vpop.eup %3513  ;;  %v2071_v32 = vpop.permute.xlu0 %2070  ;;  %v1999_v62 = vsub.f32 %v3512_v15, %v3654_v3  ;;  %3529 = vtanh.f32 %v4622_v58 }
 0x179   : > { %v1998_v38 = vsub.f32 %v3514_v11, %v3653_v42  ;;  %v3516_v30 = vpop.eup %3515  ;;  %v1691_v11 = vmul.f32 0.5, %v5031_v52  ;;  %3531 = vtanh.f32 %v1690_v6  ;;  %v1877_v42 = vadd.f32 0.5, %v1813_v14  ;;  %v3656_v14 = vld [vmem:[%s3827_s8 + $0x1e8] sm:$0xff] }
 0x17a   : > { %2182 = vrot.lane.b32.xlu1 %v1997_v18, %s3731_s13  ;;  %v1692_v18 = vmul.f32 0.5, %v4287_v44  ;;  %v1814_v54 = vmul.f32 0.5, %v3516_v30  ;;  %v1693_v52 = vmul.f32 0.5, %v4284_v36  ;;  %v1694_v6 = vmul.f32 0.5, %v4299_v23 }
 0x17b   : > { %2184 = vrot.lane.b32.xlu0 %v1998_v38, %s3731_s13  ;;  %v2261_v3 = vmul.f32 %v2071_v32, %v1877_v42  ;;  %3533 = vtanh.f32 %v1691_v11  ;;  %v1696_v23 = vmul.f32 0.5, %v4312_v16  ;;  %v1698_v16 = vmul.f32 0.5, %v4324_v29 }
 0x17c   : > { %v3518_v2 = vpop.eup %3517  ;;  %v2075_v0 = vpop.permute.xlu1 %2074  ;;  %3535 = vtanh.f32 %v1692_v18  ;;  %v1878_v58 = vadd.f32 0.5, %v1814_v54  ;;  %v1700_v29 = vmul.f32 0.5, %v4336_v28  ;;  %v1702_v28 = vmul.f32 0.5, %v4348_v60 }
 0x17d   : > { %v2069_v10 = vpop.permute.xlu0 %2068  ;;  %v3520_v19 = vpop.eup %3519  ;;  %v2000_v38 = vsub.f32 %v3518_v2, %v3655_v46  ;;  %3537 = vtanh.f32 %v1693_v52  ;;  %v1695_v2 = vmul.f32 0.5, %v4296_v20  ;;  %v1697_v20 = vmul.f32 0.5, %v4308_v4  ;;  %v3658_v52 = vld [vmem:[%s3827_s8 + $0x1f8] sm:$0xff] }
 0x17e   : > { %v2260_v7 = vmul.f32 %v2069_v10, %v1876_v24  ;;  %2186 = vrot.lane.b32.xlu1 %v1999_v62, %s3731_s13  ;;  %v3522_v15 = vpop.eup %3521  ;;  %v1815_v44 = vmul.f32 0.5, %v3520_v19  ;;  %3539 = vtanh.f32 %v1694_v6  ;;  %v1704_v60 = vmul.f32 0.5, %v4360_v22 }
 0x17f   : > { %v2001_v62 = vsub.f32 %v3522_v15, %v3656_v14  ;;  %v3524_v10 = vpop.eup %3523  ;;  %v3657_v15 = vld [vmem:[%s3827_s8 + $0x1f0] sm:$0xff]  ;;  %3541 = vtanh.f32 %v1695_v2  ;;  %v1706_v22 = vmul.f32 0.5, %v4372_v25  ;;  %v1708_v25 = vmul.f32 0.5, %v4384_v40 }
 0x180   : > { %2388 = vrot.lane.b32.xlu0 %v2260_v7, %s3731_s13  ;;  %v2073_v50 = vpop.permute.xlu1 %2072  ;;  %v3526_v30 = vpop.eup %3525  ;;  %v1879_v19 = vadd.f32 0.5, %v1815_v44  ;;  %v1816_v42 = vmul.f32 0.5, %v3524_v10  ;;  %3543 = vtanh.f32 %v1696_v23  ;;  %v1710_v40 = vmul.f32 0.5, %v4396_v27 }
 0x181   : > { %v2077_v24 = vpop.permute.xlu0 %2076  ;;  %v2262_v36 = vmul.f32 %v2073_v50, %v1878_v58  ;;  %v3528_v7 = vpop.eup %3527  ;;  %v2002_v54 = vsub.f32 %v3526_v30, %v3657_v15  ;;  %3545 = vtanh.f32 %v1697_v20  ;;  %v1699_v30 = vmul.f32 0.5, %v4320_v8 }
 0x182   : > { %2390 = vrot.lane.b32.xlu1 %v2261_v3, %s3731_s13  ;;  %v3530_v18 = vpop.eup %3529  ;;  %v1817_v58 = vmul.f32 0.5, %v3528_v7  ;;  %v1880_v14 = vadd.f32 0.5, %v1816_v42  ;;  %3547 = vtanh.f32 %v1698_v16  ;;  %v1701_v8 = vmul.f32 0.5, %v4332_v48 }
 0x183   : > { %v3532_v46 = vpop.eup %3531  ;;  %v2003_v6 = vsub.f32 %v3530_v18, %v3658_v52  ;;  %3549 = vtanh.f32 %v1699_v30  ;;  %v1703_v48 = vmul.f32 0.5, %v4344_v33  ;;  %v1705_v33 = vmul.f32 0.5, %v4356_v37 }
 0x184   : > { %2188 = vrot.lane.b32.xlu0 %v2000_v38, %s3731_s13  ;;  %v2079_v32 = vpop.permute.xlu1 %2078  ;;  %v2263_v38 = vmul.f32 %v2075_v0, %v1879_v19  ;;  %v2264_v4 = vmul.f32 %v2077_v24, %v1880_v14  ;;  %3551 = vtanh.f32 %v1700_v29  ;;  %v1707_v37 = vmul.f32 0.5, %v4368_v41 }
 0x185   : > { %v2081_v11 = vpop.permute.xlu0 %2080  ;;  %v3534_v44 = vpop.eup %3533  ;;  %3553 = vtanh.f32 %v1701_v8  ;;  %v1709_v41 = vmul.f32 0.5, %v4380_v45  ;;  %v1711_v45 = vmul.f32 0.5, %v4392_v49  ;;  %v1712_v27 = vmul.f32 0.5, %v4408_v31 }
 0x186   : > { %2190 = vrot.lane.b32.xlu1 %v2001_v62, %s3731_s13  ;;  %v1818_v62 = vmul.f32 0.5, %v3532_v46  ;;  %v3536_v10 = vpop.eup %3535  ;;  %v1819_v7 = vmul.f32 0.5, %v3534_v44  ;;  %3555 = vtanh.f32 %v1702_v28  ;;  %v1713_v49 = vmul.f32 0.5, %v4404_v53 }
 0x187   : > { %v3538_v23 = vpop.eup %3537  ;;  %v1820_v18 = vmul.f32 0.5, %v3536_v10  ;;  %3557 = vtanh.f32 %v1703_v48  ;;  %v1714_v31 = vmul.f32 0.5, %v4420_v12  ;;  %v1715_v53 = vmul.f32 0.5, %v4416_v57 }
 0x188   : > { %2392 = vrot.lane.b32.xlu0 %v2262_v36, %s3731_s13  ;;  %v2083_v3 = vpop.permute.xlu1 %2082  ;;  %v1881_v36 = vadd.f32 0.5, %v1817_v58  ;;  %v1882_v19 = vadd.f32 0.5, %v1818_v62  ;;  %v3540_v42 = vpop.eup %3539  ;;  %v1821_v20 = vmul.f32 0.5, %v3538_v23  ;;  %3559 = vtanh.f32 %v1704_v60 }
 0x189   : > { %v2085_v50 = vpop.permute.xlu0 %2084  ;;  %v3542_v16 = vpop.eup %3541  ;;  %v1884_v58 = vadd.f32 0.5, %v1820_v18  ;;  %v1822_v52 = vmul.f32 0.5, %v3540_v42  ;;  %3561 = vtanh.f32 %v1705_v33  ;;  %v1716_v12 = vmul.f32 0.5, %v4432_v56 }
 0x18a   : > { %2394 = vrot.lane.b32.xlu1 %v2263_v38, %s3731_s13  ;;  %v2265_v15 = vmul.f32 %v2079_v32, %v1881_v36  ;;  %v2266_v24 = vmul.f32 %v2081_v11, %v1882_v19  ;;  %v1883_v38 = vadd.f32 0.5, %v1819_v7  ;;  %v1885_v62 = vadd.f32 0.5, %v1821_v20 }
 0x18b   : > { %v2268_v11 = vmul.f32 %v2085_v50, %v1884_v58  ;;  %v1823_v10 = vmul.f32 0.5, %v3542_v16  ;;  %3563 = vtanh.f32 %v1706_v22  ;;  %v1717_v57 = vmul.f32 0.5, %v4428_v61 }
 0x18c   : > { %2192 = vrot.lane.b32.xlu0 %v2002_v54, %s3731_s13  ;;  %v2087_v0 = vpop.permute.xlu1 %2086  ;;  %v2267_v32 = vmul.f32 %v2083_v3, %v1883_v38  ;;  %3565 = vtanh.f32 %v1707_v37  ;;  %v1718_v56 = vmul.f32 0.5, %v4444_v35  ;;  %v1719_v61 = vmul.f32 0.5, %v4440_v1 }
 0x18d   : > { %v2089_v2 = vpop.permute.xlu0 %2088  ;;  %v2269_v3 = vmul.f32 %v2087_v0, %v1885_v62  ;;  %v1887_v19 = vadd.f32 0.5, %v1823_v10  ;;  %3567 = vtanh.f32 %v1708_v25  ;;  %v1720_v35 = vmul.f32 0.5, %v4456_v39 }
 0x18e   : > { %2194 = vrot.lane.b32.xlu1 %v2003_v6, %s3731_s13  ;;  %v3544_v6 = vpop.eup %3543  ;;  %3569 = vtanh.f32 %v1709_v41  ;;  %v1721_v1 = vmul.f32 0.5, %v4452_v5  ;;  %v1722_v39 = vmul.f32 0.5, %v4468_v43  ;;  %v1723_v5 = vmul.f32 0.5, %v4464_v9 }
 0x18f   : > { %v3546_v30 = vpop.eup %3545  ;;  %v1824_v29 = vmul.f32 0.5, %v3544_v6  ;;  %3571 = vtanh.f32 %v1710_v40  ;;  %v1724_v43 = vmul.f32 0.5, %v4480_v47  ;;  %v1725_v9 = vmul.f32 0.5, %v4476_v13 }
 0x190   : > { %2396 = vrot.lane.b32.xlu0 %v2264_v4, %s3731_s13  ;;  %v2091_v54 = vpop.permute.xlu1 %2090  ;;  %v1886_v4 = vadd.f32 0.5, %v1822_v52  ;;  %v3548_v36 = vpop.eup %3547  ;;  %v1825_v18 = vmul.f32 0.5, %v3546_v30  ;;  %3573 = vtanh.f32 %v1711_v45  ;;  %v1726_v47 = vmul.f32 0.5, %v4492_v51 }
 0x191   : > { %v2093_v46 = vpop.permute.xlu0 %2092  ;;  %v3550_v42 = vpop.eup %3549  ;;  %v1826_v8 = vmul.f32 0.5, %v3548_v36  ;;  %v2271_v0 = vmul.f32 %v2091_v54, %v1887_v19  ;;  %3575 = vtanh.f32 %v1712_v27  ;;  %v1727_v13 = vmul.f32 0.5, %v4488_v17 }
 0x192   : > { %2398 = vrot.lane.b32.xlu1 %v2265_v15, %s3731_s13  ;;  %v2270_v50 = vmul.f32 %v2089_v2, %v1886_v4  ;;  %v1888_v15 = vadd.f32 0.5, %v1824_v29  ;;  %v1889_v20 = vadd.f32 0.5, %v1825_v18  ;;  %v1827_v16 = vmul.f32 0.5, %v3550_v42 }
 0x193   : > { %v1890_v52 = vadd.f32 0.5, %v1826_v8  ;;  %3577 = vtanh.f32 %v1713_v49  ;;  %v1728_v51 = vmul.f32 0.5, %v4504_v55  ;;  %v1729_v17 = vmul.f32 0.5, %v4500_v21 }
 0x194   : > { %2400 = vrot.lane.b32.xlu0 %v2266_v24, %s3731_s13  ;;  %v2095_v44 = vpop.permute.xlu1 %2094  ;;  %v3552_v24 = vpop.eup %3551  ;;  %v2272_v2 = vmul.f32 %v2093_v46, %v1888_v15  ;;  %v1891_v60 = vadd.f32 0.5, %v1827_v16  ;;  %3579 = vtanh.f32 %v1714_v31  ;;  %v1730_v55 = vmul.f32 0.5, %v4516_v59 }
 0x195   : > { %v2097_v14 = vpop.permute.xlu0 %2096  ;;  %v3554_v58 = vpop.eup %3553  ;;  %v1828_v6 = vmul.f32 0.5, %v3552_v24  ;;  %v2273_v54 = vmul.f32 %v2095_v44, %v1889_v20  ;;  %3581 = vtanh.f32 %v1715_v53  ;;  %v1731_v21 = vmul.f32 0.5, %v4512_v26 }
 0x196   : > { %2402 = vrot.lane.b32.xlu1 %v2267_v32, %s3731_s13  ;;  %v3556_v32 = vpop.eup %3555  ;;  %v2274_v46 = vmul.f32 %v2097_v14, %v1890_v52  ;;  %v1829_v62 = vmul.f32 0.5, %v3554_v58  ;;  %3583 = vtanh.f32 %v1716_v12  ;;  %v1732_v59 = vmul.f32 0.5, %v4528_v63 }
 0x197   : > { %v3558_v10 = vpop.eup %3557  ;;  %v1892_v30 = vadd.f32 0.5, %v1828_v6  ;;  %v1830_v4 = vmul.f32 0.5, %v3556_v32  ;;  %3585 = vtanh.f32 %v1717_v57  ;;  %v1733_v26 = vmul.f32 0.5, %v4524_v34 }
 0x198   : > { %2404 = vrot.lane.b32.xlu0 %v2268_v11, %s3731_s13  ;;  %v2099_v7 = vpop.permute.xlu1 %2098  ;;  %v3560_v29 = vpop.eup %3559  ;;  %v1893_v33 = vadd.f32 0.5, %v1829_v62  ;;  %3587 = vtanh.f32 %v1718_v56 }
 0x199   : > { %v2101_v23 = vpop.permute.xlu0 %2100  ;;  %v2275_v44 = vmul.f32 %v2099_v7, %v1891_v60  ;;  %v3562_v22 = vpop.eup %3561  ;;  %v1894_v19 = vadd.f32 0.5, %v1830_v4  ;;  %v1832_v18 = vmul.f32 0.5, %v3560_v29  ;;  %3589 = vtanh.f32 %v1719_v61 }
 0x19a   : > { %2406 = vrot.lane.b32.xlu1 %v2269_v3, %s3731_s13  ;;  %v2276_v14 = vmul.f32 %v2101_v23, %v1892_v30  ;;  %v3564_v42 = vpop.eup %3563  ;;  %3591 = vtanh.f32 %v1720_v35 }
 0x19b   : > { %v3566_v37 = vpop.eup %3565  ;;  %v1834_v25 = vmul.f32 0.5, %v3564_v42  ;;  %3593 = vtanh.f32 %v1721_v1 }
 0x19c   : > { %2408 = vrot.lane.b32.xlu0 %v2270_v50, %s3731_s13  ;;  %v2103_v28 = vpop.permute.xlu1 %2102  ;;  %v1831_v50 = vmul.f32 0.5, %v3558_v10  ;;  %v3568_v20 = vpop.eup %3567  ;;  %v1835_v6 = vmul.f32 0.5, %v3566_v37  ;;  %3595 = vtanh.f32 %v1722_v39 }
 0x19d   : > { %v2105_v38 = vpop.permute.xlu0 %2104  ;;  %v2277_v7 = vmul.f32 %v2103_v28, %v1893_v33  ;;  %v3570_v32 = vpop.eup %3569  ;;  %v1836_v41 = vmul.f32 0.5, %v3568_v20  ;;  %3597 = vtanh.f32 %v1723_v5 }
 0x19e   : > { %2410 = vrot.lane.b32.xlu1 %v2271_v0, %s3731_s13  ;;  %v2278_v23 = vmul.f32 %v2105_v38, %v1894_v19  ;;  %v1895_v24 = vadd.f32 0.5, %v1831_v50  ;;  %v1833_v0 = vmul.f32 0.5, %v3562_v22  ;;  %v1899_v62 = vadd.f32 0.5, %v1835_v6 }
 0x19f   : > { %v1837_v10 = vmul.f32 0.5, %v3570_v32  ;;  %v1900_v4 = vadd.f32 0.5, %v1836_v41  ;;  %3599 = vtanh.f32 %v1724_v43 }
 0x1a0   : > { %2412 = vrot.lane.b32.xlu0 %v2272_v2, %s3731_s13  ;;  %v2107_v48 = vpop.permute.xlu1 %2106  ;;  %v1896_v2 = vadd.f32 0.5, %v1832_v18  ;;  %v1897_v52 = vadd.f32 0.5, %v1833_v0  ;;  %3601 = vtanh.f32 %v1725_v9 }
 0x1a1   : > { %v2109_v11 = vpop.permute.xlu0 %2108  ;;  %v2279_v28 = vmul.f32 %v2107_v48, %v1895_v24  ;;  %v1901_v27 = vadd.f32 0.5, %v1837_v10 }
 0x1a2   : > { %2414 = vrot.lane.b32.xlu1 %v2273_v54, %s3731_s13  ;;  %v2280_v38 = vmul.f32 %v2109_v11, %v1896_v2  ;;  %v1898_v54 = vadd.f32 0.5, %v1834_v25 }
 0x1a4   : > { %2416 = vrot.lane.b32.xlu0 %v2274_v46, %s3731_s13  ;;  %v2111_v36 = vpop.permute.xlu1 %2110  ;;  %v3572_v46 = vpop.eup %3571  ;;  %3603 = vtanh.f32 %v1726_v47 }
 0x1a5   : > { %v2113_v3 = vpop.permute.xlu0 %2112  ;;  %v2281_v48 = vmul.f32 %v2111_v36, %v1897_v52  ;;  %v3574_v30 = vpop.eup %3573  ;;  %v1838_v29 = vmul.f32 0.5, %v3572_v46  ;;  %3605 = vtanh.f32 %v1727_v13 }
 0x1a6   : > { %2418 = vrot.lane.b32.xlu1 %v2275_v44, %s3731_s13  ;;  %v2282_v11 = vmul.f32 %v2113_v3, %v1898_v54  ;;  %v3576_v44 = vpop.eup %3575  ;;  %v1839_v33 = vmul.f32 0.5, %v3574_v30  ;;  %3607 = vtanh.f32 %v1728_v51  ;;  %v5036_v51 = vld [vmem:[#allocation8_spill] sm:$0xff] }
 0x1a7   : > { %v3578_v50 = vpop.eup %3577  ;;  %v1902_v22 = vadd.f32 0.5, %v1838_v29  ;;  %v1840_v19 = vmul.f32 0.5, %v3576_v44  ;;  %3609 = vtanh.f32 %v1729_v17 }
 0x1a8   : > { %2420 = vrot.lane.b32.xlu0 %v2276_v14, %s3731_s13  ;;  %v2115_v15 = vpop.permute.xlu1 %2114  ;;  %v3580_v18 = vpop.eup %3579  ;;  %3611 = vtanh.f32 %v1730_v55 }
 0x1a9   : > { %v2117_v8 = vpop.permute.xlu0 %2116  ;;  %v2283_v36 = vmul.f32 %v2115_v15, %v1899_v62  ;;  %v3582_v31 = vpop.eup %3581  ;;  %v1904_v24 = vadd.f32 0.5, %v1840_v19  ;;  %v1842_v0 = vmul.f32 0.5, %v3580_v18  ;;  %3613 = vtanh.f32 %v1731_v21 }
 0x1aa   : > { %2422 = vrot.lane.b32.xlu1 %v2277_v7, %s3731_s13  ;;  %v2284_v14 = vmul.f32 %v2117_v8, %v1900_v4  ;;  %v1841_v8 = vmul.f32 0.5, %v3578_v50  ;;  %v3584_v37 = vpop.eup %3583  ;;  %v1843_v53 = vmul.f32 0.5, %v3582_v31  ;;  %3615 = vtanh.f32 %v1732_v59  ;;  %v5039_v59 = vld [vmem:[#allocation3_spill] sm:$0xff] }
 0x1ab   : > { %v1844_v12 = vmul.f32 0.5, %v3584_v37 }
 0x1ac   : > { %2424 = vrot.lane.b32.xlu0 %v2278_v23, %s3731_s13  ;;  %v2119_v16 = vpop.permute.xlu1 %2118  ;;  %v1903_v23 = vadd.f32 0.5, %v1839_v33  ;;  %v1907_v46 = vadd.f32 0.5, %v1843_v53 }
 0x1ad   : > { %v2121_v58 = vpop.permute.xlu0 %2120  ;;  %v2285_v42 = vmul.f32 %v2119_v16, %v1901_v27  ;;  %v1905_v16 = vadd.f32 0.5, %v1841_v8  ;;  %v1908_v57 = vadd.f32 0.5, %v1844_v12 }
 0x1ae   : > { %2426 = vrot.lane.b32.xlu1 %v2279_v28, %s3731_s13  ;;  %v2286_v15 = vmul.f32 %v2121_v58, %v1902_v22  ;;  %v1906_v58 = vadd.f32 0.5, %v1842_v0 }
 0x1b0   : > { %2428 = vrot.lane.b32.xlu0 %v2280_v38, %s3731_s13  ;;  %v2123_v40 = vpop.permute.xlu1 %2122  ;;  %v3586_v38 = vpop.eup %3585  ;;  %3617 = vtanh.f32 %v1733_v26 }
 0x1b1   : > { %v2125_v60 = vpop.permute.xlu0 %2124  ;;  %v2287_v2 = vmul.f32 %v2123_v40, %v1903_v23  ;;  %v3588_v52 = vpop.eup %3587 }
 0x1b2   : > { %2430 = vrot.lane.b32.xlu1 %v2281_v48, %s3731_s13  ;;  %v2288_v20 = vmul.f32 %v2125_v60, %v1904_v24  ;;  %v1845_v48 = vmul.f32 0.5, %v3586_v38  ;;  %v3590_v40 = vpop.eup %3589 }
 0x1b3   : > { %v3592_v60 = vpop.eup %3591  ;;  %v1847_v29 = vmul.f32 0.5, %v3590_v40 }
 0x1b4   : > { %2432 = vrot.lane.b32.xlu0 %v2282_v11, %s3731_s13  ;;  %v2127_v45 = vpop.permute.xlu1 %2126  ;;  %v1846_v11 = vmul.f32 0.5, %v3588_v52  ;;  %v1909_v4 = vadd.f32 0.5, %v1845_v48  ;;  %v3594_v44 = vpop.eup %3593 }
 0x1b5   : > { %v2129_v3 = vpop.permute.xlu0 %2128  ;;  %v2289_v6 = vmul.f32 %v2127_v45, %v1905_v16  ;;  %v1848_v45 = vmul.f32 0.5, %v3592_v60  ;;  %v3596_v61 = vpop.eup %3595  ;;  %v1911_v33 = vadd.f32 0.5, %v1847_v29  ;;  %v1849_v50 = vmul.f32 0.5, %v3594_v44 }
 0x1b6   : > { %2434 = vrot.lane.b32.xlu1 %v2283_v36, %s3731_s13  ;;  %v2290_v54 = vmul.f32 %v2129_v3, %v1906_v58  ;;  %v1910_v36 = vadd.f32 0.5, %v1846_v11  ;;  %v3598_v22 = vpop.eup %3597  ;;  %v1850_v18 = vmul.f32 0.5, %v3596_v61 }
 0x1b7   : > { %v1912_v19 = vadd.f32 0.5, %v1848_v45  ;;  %v1913_v39 = vadd.f32 0.5, %v1849_v50  ;;  %v1851_v23 = vmul.f32 0.5, %v3598_v22  ;;  %v5038_v50 = vld [vmem:[#allocation4_spill] sm:$0xff] }
 0x1b8   : > { %2436 = vrot.lane.b32.xlu0 %v2284_v14, %s3731_s13  ;;  %v2131_v7 = vpop.permute.xlu1 %2130  ;;  %v1914_v31 = vadd.f32 0.5, %v1850_v18  ;;  %v1740_v22 = vmul.f32 0.5, %v5038_v50 }
 0x1b9   : > { %v2133_v49 = vpop.permute.xlu0 %2132  ;;  %v2291_v56 = vmul.f32 %v2131_v7, %v1907_v46 }
 0x1ba   : > { %2438 = vrot.lane.b32.xlu1 %v2285_v42, %s3731_s13  ;;  %v2292_v10 = vmul.f32 %v2133_v49, %v1908_v57  ;;  %v3600_v42 = vpop.eup %3599 }
 0x1bb   : > { %v3602_v8 = vpop.eup %3601  ;;  %v1852_v24 = vmul.f32 0.5, %v3600_v42 }
 0x1bc   : > { %2440 = vrot.lane.b32.xlu0 %v2286_v15, %s3731_s13  ;;  %v2135_v25 = vpop.permute.xlu1 %2134  ;;  %v3604_v0 = vpop.eup %3603  ;;  %v1853_v43 = vmul.f32 0.5, %v3602_v8 }
 0x1bd   : > { %v2137_v28 = vpop.permute.xlu0 %2136  ;;  %v2293_v14 = vmul.f32 %v2135_v25, %v1909_v4  ;;  %v3606_v16 = vpop.eup %3605  ;;  %v1916_v53 = vadd.f32 0.5, %v1852_v24  ;;  %v1854_v38 = vmul.f32 0.5, %v3604_v0  ;;  %v1738_v4 = vmul.f32 0.5, %v5036_v51 }
 0x1be   : > { %2442 = vrot.lane.b32.xlu1 %v2287_v2, %s3731_s13  ;;  %v2294_v35 = vmul.f32 %v2137_v28, %v1910_v36  ;;  %v1915_v28 = vadd.f32 0.5, %v1851_v23  ;;  %v3608_v58 = vpop.eup %3607  ;;  %v1917_v47 = vadd.f32 0.5, %v1853_v43  ;;  %v1855_v46 = vmul.f32 0.5, %v3606_v16 }
 0x1bf   : > { %v3610_v48 = vpop.eup %3609  ;;  %v1918_v40 = vadd.f32 0.5, %v1854_v38  ;;  %v1856_v57 = vmul.f32 0.5, %v3608_v58  ;;  %v5042_v38 = vld [vmem:[#allocation6_spill] sm:$0xff] }
 0x1c0   : > { %2444 = vrot.lane.b32.xlu0 %v2288_v20, %s3731_s13  ;;  %v2139_v32 = vpop.permute.xlu1 %2138  ;;  %v5032_v20 = vld [vmem:[#allocation15_spill] sm:$0xff]  ;;  %v3612_v11 = vpop.eup %3611  ;;  %v1919_v29 = vadd.f32 0.5, %v1855_v46  ;;  %v1857_v44 = vmul.f32 0.5, %v3610_v48  ;;  %v1744_v58 = vmul.f32 0.5, %v5042_v38  ;;  %v3661_v38 = vld [vmem:[%s3827_s8 + $0x10] sm:$0xff] }
 0x1c1   : > { %v2141_v41 = vpop.permute.xlu0 %2140  ;;  %v2295_v7 = vmul.f32 %v2139_v32, %v1911_v33  ;;  %v1734_v63 = vmul.f32 0.5, %v5032_v20  ;;  %v3614_v36 = vpop.eup %3613  ;;  %v1920_v45 = vadd.f32 0.5, %v1856_v57  ;;  %v1858_v61 = vmul.f32 0.5, %v3612_v11  ;;  %v5044_v57 = vld [vmem:[#allocation9_spill] sm:$0xff] }
 0x1c2   : > { %2446 = vrot.lane.b32.xlu1 %v2289_v6, %s3731_s13  ;;  %v2296_v15 = vmul.f32 %v2141_v41, %v1912_v19  ;;  %v5033_v6 = vld [vmem:[#allocation14_spill] sm:$0xff]  ;;  %v1921_v19 = vadd.f32 0.5, %v1857_v44  ;;  %v1859_v18 = vmul.f32 0.5, %v3614_v36  ;;  %v1746_v11 = vmul.f32 0.5, %v5044_v57 }
 0x1c3   : > { %v1735_v34 = vmul.f32 0.5, %v5033_v6  ;;  %3619 = vtanh.f32 %v1734_v63 }
 0x1c4   : > { %2448 = vrot.lane.b32.xlu0 %v2290_v54, %s3731_s13  ;;  %v2143_v62 = vpop.permute.xlu1 %2142  ;;  %v5034_v54 = vld [vmem:[#allocation17_spill] sm:$0xff]  ;;  %v1923_v0 = vadd.f32 0.5, %v1859_v18 }
 0x1c5   : > { %v2145_v30 = vpop.permute.xlu0 %2144  ;;  %v2297_v37 = vmul.f32 %v2143_v62, %v1913_v39  ;;  %v1736_v41 = vmul.f32 0.5, %v5034_v54  ;;  %3621 = vtanh.f32 %v1735_v34  ;;  %v5035_v62 = vld [vmem:[#allocation16_spill] sm:$0xff]  ;;  %v1741_v39 = vmul.f32 0.5, %v5039_v59 }
 0x1c6   : > { %2450 = vrot.lane.b32.xlu1 %v2291_v56, %s3731_s13  ;;  %v2298_v25 = vmul.f32 %v2145_v30, %v1914_v31  ;;  %v1737_v13 = vmul.f32 0.5, %v5035_v62  ;;  %v5040_v31 = vld [vmem:[#allocation5_spill] sm:$0xff] }
 0x1c7   : > { %3623 = vtanh.f32 %v1736_v41  ;;  %v1742_v24 = vmul.f32 0.5, %v5040_v31 }
 0x1c8   : > { %2452 = vrot.lane.b32.xlu0 %v2292_v10, %s3731_s13  ;;  %v2147_v3 = vpop.permute.xlu1 %2146  ;;  %3625 = vtanh.f32 %v1737_v13 }
 0x1c9   : > { %v2149_v27 = vpop.permute.xlu0 %2148  ;;  %v2299_v12 = vmul.f32 %v2147_v3, %v1915_v28  ;;  %3627 = vtanh.f32 %v1738_v4  ;;  %v5041_v28 = vld [vmem:[#allocation7_spill] sm:$0xff] }
 0x1ca   : > { %2454 = vrot.lane.b32.xlu1 %v2293_v14, %s3731_s13  ;;  %v2300_v32 = vmul.f32 %v2149_v27, %v1916_v53  ;;  %v3616_v14 = vpop.eup %3615  ;;  %v1743_v43 = vmul.f32 0.5, %v5041_v28 }
 0x1cb   : > { %v3618_v42 = vpop.eup %3617 }
 0x1cc   : > { %2456 = vrot.lane.b32.xlu0 %v2294_v35, %s3731_s13  ;;  %v2151_v1 = vpop.permute.xlu1 %2150  ;;  %v5037_v35 = vld [vmem:[#allocation2_spill] sm:$0xff] }
 0x1cd   : > { %v2153_v49 = vpop.permute.xlu0 %2152  ;;  %v2301_v60 = vmul.f32 %v2151_v1, %v1917_v47  ;;  %v1739_v27 = vmul.f32 0.5, %v5037_v35  ;;  %v1860_v1 = vmul.f32 0.5, %v3616_v14  ;;  %v3620_v21 = vpop.eup %3619  ;;  %v5043_v47 = vld [vmem:[#allocation10_spill] sm:$0xff] }
 0x1ce   : > { %2458 = vrot.lane.b32.xlu1 %v2295_v7, %s3731_s13  ;;  %v2302_v10 = vmul.f32 %v2153_v49, %v1918_v40  ;;  %v1922_v7 = vadd.f32 0.5, %v1858_v61  ;;  %v1745_v46 = vmul.f32 0.5, %v5043_v47 }
 0x1cf   : > { %3629 = vtanh.f32 %v1739_v27  ;;  %v1924_v26 = vadd.f32 0.5, %v1860_v1 }
 0x1d0   : > { %2460 = vrot.lane.b32.xlu0 %v2296_v15, %s3731_s13  ;;  %v2155_v2 = vpop.permute.xlu1 %2154  ;;  %3631 = vtanh.f32 %v1740_v22 }
 0x1d1   : > { %v2157_v5 = vpop.permute.xlu0 %2156  ;;  %v2303_v3 = vmul.f32 %v2155_v2, %v1919_v29  ;;  %v3622_v2 = vpop.eup %3621  ;;  %3633 = vtanh.f32 %v1741_v39  ;;  %v5045_v29 = vld [vmem:[#allocation11_spill] sm:$0xff] }
 0x1d2   : > { %2462 = vrot.lane.b32.xlu1 %v2297_v37, %s3731_s13  ;;  %v2304_v55 = vmul.f32 %v2157_v5, %v1920_v45  ;;  %v1861_v37 = vmul.f32 0.5, %v3618_v42  ;;  %v3624_v5 = vpop.eup %3623  ;;  %3635 = vtanh.f32 %v1742_v24  ;;  %v1747_v44 = vmul.f32 0.5, %v5045_v29  ;;  %v3659_v42 = vld [vmem:[%s3827_s8] sm:$0xff] }
 0x1d3   : > { %v3626_v6 = vpop.eup %3625  ;;  %3637 = vtanh.f32 %v1743_v43 }
 0x1d4   : > { %2464 = vrot.lane.b32.xlu0 %v2298_v25, %s3731_s13  ;;  %v2159_v52 = vpop.permute.xlu1 %2158  ;;  %v1862_v25 = vmul.f32 0.5, %v3620_v21  ;;  %3639 = vtanh.f32 %v1744_v58 }
 0x1d5   : > { %v2161_v9 = vpop.permute.xlu0 %2160  ;;  %v2305_v15 = vmul.f32 %v2159_v52, %v1921_v19  ;;  %v1863_v52 = vmul.f32 0.5, %v3622_v2  ;;  %3641 = vtanh.f32 %v1745_v46 }
 0x1d6   : > { %2466 = vrot.lane.b32.xlu1 %v2299_v12, %s3731_s13  ;;  %v2306_v23 = vmul.f32 %v2161_v9, %v1922_v7  ;;  %v1925_v12 = vadd.f32 0.5, %v1861_v37  ;;  %v1926_v34 = vadd.f32 0.5, %v1862_v25  ;;  %v3628_v9 = vpop.eup %3627  ;;  %3643 = vtanh.f32 %v1746_v11 }
 0x1d7   : > { %3645 = vtanh.f32 %v1747_v44 }
 0x1d8   : > { %2468 = vrot.lane.b32.xlu0 %v2300_v32, %s3731_s13  ;;  %v2163_v56 = vpop.permute.xlu1 %2162  ;;  %v1864_v32 = vmul.f32 0.5, %v3624_v5 }
 0x1d9   : > { %v2165_v30 = vpop.permute.xlu0 %2164  ;;  %v2307_v20 = vmul.f32 %v2163_v56, %v1923_v0  ;;  %v1865_v56 = vmul.f32 0.5, %v3626_v6  ;;  %v3630_v62 = vpop.eup %3629 }
 0x1da   : > { %2470 = vrot.lane.b32.xlu1 %v2301_v60, %s3731_s13  ;;  %v2308_v16 = vmul.f32 %v2165_v30, %v1924_v26  ;;  %v1927_v60 = vadd.f32 0.5, %v1863_v52  ;;  %v1928_v13 = vadd.f32 0.5, %v1864_v32  ;;  %v3632_v30 = vpop.eup %3631  ;;  %v1867_v14 = vmul.f32 0.5, %v3630_v62 }
 0x1db   : > { %v1929_v61 = vadd.f32 0.5, %v1865_v56  ;;  %v1868_v35 = vmul.f32 0.5, %v3632_v30 }
 0x1dc   : > { %2472 = vrot.lane.b32.xlu0 %v2302_v10, %s3731_s13  ;;  %v2167_v17 = vpop.permute.xlu1 %2166  ;;  %v1866_v10 = vmul.f32 0.5, %v3628_v9  ;;  %v1931_v19 = vadd.f32 0.5, %v1867_v14  ;;  %v3666_v14 = vld [vmem:[%s3827_s8 + $0x38] sm:$0xff] }
 0x1dd   : > { %v2169_v33 = vpop.permute.xlu0 %2168  ;;  %v2309_v54 = vmul.f32 %v2167_v17, %v1925_v12  ;;  %v1932_v21 = vadd.f32 0.5, %v1868_v35  ;;  %v3667_v35 = vld [vmem:[%s3827_s8 + $0x40] sm:$0xff] }
 0x1de   : > { %2474 = vrot.lane.b32.xlu1 %v2303_v3, %s3731_s13  ;;  %v2310_v48 = vmul.f32 %v2169_v33, %v1926_v34  ;;  %v3634_v3 = vpop.eup %3633  ;;  %v1930_v17 = vadd.f32 0.5, %v1866_v10 }
 0x1df   : > { %v3636_v27 = vpop.eup %3635  ;;  %v1869_v18 = vmul.f32 0.5, %v3634_v3 }
 0x1e0   : > { %2476 = vrot.lane.b32.xlu0 %v2304_v55, %s3731_s13  ;;  %v2171_v49 = vpop.permute.xlu1 %2170  ;;  %v3638_v1 = vpop.eup %3637 }
 0x1e1   : > { %v2173_v8 = vpop.permute.xlu0 %2172  ;;  %v2311_v51 = vmul.f32 %v2171_v49, %v1927_v60  ;;  %v3640_v49 = vpop.eup %3639  ;;  %v1933_v0 = vadd.f32 0.5, %v1869_v18  ;;  %v1871_v37 = vmul.f32 0.5, %v3638_v1 }
 0x1e2   : > { %2478 = vrot.lane.b32.xlu1 %v2305_v15, %s3731_s13  ;;  %v2312_v36 = vmul.f32 %v2173_v8, %v1928_v13  ;;  %v1870_v15 = vmul.f32 0.5, %v3636_v27  ;;  %v3660_v8 = vld [vmem:[%s3827_s8 + $0x8] sm:$0xff]  ;;  %v3642_v2 = vpop.eup %3641  ;;  %v1872_v25 = vmul.f32 0.5, %v3640_v49  ;;  %v3663_v13 = vld [vmem:[%s3827_s8 + $0x20] sm:$0xff] }
 0x1e3   : > { %v3644_v5 = vpop.eup %3643 }
 0x1e4   : > { %2480 = vrot.lane.b32.xlu0 %v2306_v23, %s3731_s13  ;;  %v2175_v63 = vpop.permute.xlu1 %2174  ;;  %v1934_v26 = vadd.f32 0.5, %v1870_v15  ;;  %v3646_v12 = vpop.eup %3645  ;;  %v1936_v52 = vadd.f32 0.5, %v1872_v25  ;;  %v1874_v6 = vmul.f32 0.5, %v3644_v5  ;;  %v3671_v15 = vld [vmem:[%s3827_s8 + $0x60] sm:$0xff] }
 0x1e5   : > { %v2177_v53 = vpop.permute.xlu0 %2176  ;;  %v2313_v55 = vmul.f32 %v2175_v63, %v1929_v61  ;;  %v3675_v25 = vld [vmem:[%s3827_s8 + $0x80] sm:$0xff] }
 0x1e6   : > { %2482 = vrot.lane.b32.xlu1 %v2307_v20, %s3731_s13  ;;  %v2314_v50 = vmul.f32 %v2177_v53, %v1930_v17  ;;  %v1873_v53 = vmul.f32 0.5, %v3642_v2 }
 0x1e8   : > { %2484 = vrot.lane.b32.xlu0 %v2308_v16, %s3731_s13  ;;  %v2179_v41 = vpop.permute.xlu1 %2178  ;;  %v1935_v16 = vadd.f32 0.5, %v1871_v37  ;;  %v1937_v46 = vadd.f32 0.5, %v1873_v53  ;;  %v3674_v37 = vld [vmem:[%s3827_s8 + $0x78] sm:$0xff] }
 0x1e9   : > { %v2181_v40 = vpop.permute.xlu0 %2180  ;;  %v2315_v59 = vmul.f32 %v2179_v41, %v1931_v19  ;;  %v3669_v19 = vld [vmem:[%s3827_s8 + $0x50] sm:$0xff] }
 0x1ea   : > { %2486 = vrot.lane.b32.xlu1 %v2309_v54, %s3731_s13  ;;  %v2316_v23 = vmul.f32 %v2181_v40, %v1932_v21  ;;  %v3662_v54 = vld [vmem:[%s3827_s8 + $0x18] sm:$0xff]  ;;  %v1938_v40 = vadd.f32 0.5, %v1874_v6  ;;  %v3679_v6 = vld [vmem:[%s3827_s8 + $0xa0] sm:$0xff] }
 0x1ec   : > { %2488 = vrot.lane.b32.xlu0 %v2310_v48, %s3731_s13  ;;  %v2183_v4 = vpop.permute.xlu1 %2182  ;;  %v1875_v48 = vmul.f32 0.5, %v3646_v12 }
 0x1ed   : > { %v2185_v45 = vpop.permute.xlu0 %2184  ;;  %v2317_v20 = vmul.f32 %v2183_v4, %v1933_v0  ;;  %v3664_v4 = vld [vmem:[%s3827_s8 + $0x28] sm:$0xff] }
 0x1ee   : > { %2490 = vrot.lane.b32.xlu1 %v2311_v51, %s3731_s13  ;;  %v2318_v28 = vmul.f32 %v2185_v45, %v1934_v26  ;;  %v1939_v62 = vadd.f32 0.5, %v1875_v48 }
 0x1f0   : > { %2492 = vrot.lane.b32.xlu0 %v2312_v36, %s3731_s13  ;;  %v2187_v33 = vpop.permute.xlu1 %2186  ;;  %v3665_v36 = vld [vmem:[%s3827_s8 + $0x30] sm:$0xff] }
 0x1f1   : > { %v2319_v34 = vmul.f32 %v2187_v33, %v1935_v16  ;;  %v3668_v33 = vld [vmem:[%s3827_s8 + $0x48] sm:$0xff]  ;;  %v3677_v16 = vld [vmem:[%s3827_s8 + $0x90] sm:$0xff] }
 0x1f2   : > { %v2389_v22 = vpop.permute.xlu0 %2388  ;;  %2494 = vrot.lane.b32.xlu1 %v2313_v55, %s3731_s13 }
 0x1f3   : > { %v2580_v7 = vadd.f32 %v3659_v42, %v2389_v22 }
 0x1f4   : > { %2496 = vrot.lane.b32.xlu0 %v2314_v50, %s3731_s13  ;;  %v2391_v39 = vpop.permute.xlu1 %2390 }
 0x1f5   : > { %2644 = vst.msk [vmem:[%s4754_s16] sm:$0xff] %vm394_vm0, %v2580_v7  ;;  %v2581_v31 = vadd.f32 %v3660_v8, %v2391_v39  ;;  %v3670_v7 = vld [vmem:[%s3827_s8 + $0x58] sm:$0xff]  ;;  %v3672_v39 = vld [vmem:[%s3827_s8 + $0x68] sm:$0xff] }
 0x1f6   : > { %v2189_v24 = vpop.permute.xlu0 %2188  ;;  %2498 = vrot.lane.b32.xlu1 %v2315_v59, %s3731_s13 }
 0x1f7   : > { %2645 = vst.msk [vmem:[%s4754_s16 + $0x8] sm:$0xff] %vm394_vm0, %v2581_v31  ;;  %v2320_v9 = vmul.f32 %v2189_v24, %v1936_v52  ;;  %v3673_v31 = vld [vmem:[%s3827_s8 + $0x70] sm:$0xff] }
 0x1f8   : > { %2500 = vrot.lane.b32.xlu0 %v2316_v23, %s3731_s13  ;;  %v2191_v63 = vpop.permute.xlu1 %2190 }
 0x1f9   : > { %v2321_v57 = vmul.f32 %v2191_v63, %v1937_v46  ;;  %v3676_v63 = vld [vmem:[%s3827_s8 + $0x88] sm:$0xff] }
 0x1fa   : > { %v2393_v43 = vpop.permute.xlu0 %2392  ;;  %2502 = vrot.lane.b32.xlu1 %v2317_v20, %s3731_s13 }
 0x1fb   : > { %v2582_v58 = vadd.f32 %v3661_v38, %v2393_v43 }
 0x1fc   : > { %2504 = vrot.lane.b32.xlu0 %v2318_v28, %s3731_s13  ;;  %v2395_v32 = vpop.permute.xlu1 %2394 }
 0x1fd   : > { %2646 = vst.msk [vmem:[%s4754_s16 + $0x10] sm:$0xff] %vm394_vm0, %v2582_v58  ;;  %v2583_v41 = vadd.f32 %v3662_v54, %v2395_v32  ;;  %v3678_v58 = vld [vmem:[%s3827_s8 + $0x98] sm:$0xff] }
 0x1fe   : > { %v2193_v47 = vpop.permute.xlu0 %2192  ;;  %2506 = vrot.lane.b32.xlu1 %v2319_v34, %s3731_s13 }
 0x1ff   : > { %2647 = vst.msk [vmem:[%s4754_s16 + $0x18] sm:$0xff] %vm394_vm0, %v2583_v41  ;;  %v2322_v60 = vmul.f32 %v2193_v47, %v1938_v40  ;;  %v3681_v47 = vld [vmem:[%s3827_s8 + $0xb0] sm:$0xff]  ;;  %v3682_v40 = vld [vmem:[%s3827_s8 + $0xb8] sm:$0xff] }
 0x200   : > { %2508 = vrot.lane.b32.xlu0 %v2320_v9, %s3731_s13  ;;  %v2195_v11 = vpop.permute.xlu1 %2194  ;;  %v3680_v9 = vld [vmem:[%s3827_s8 + $0xa8] sm:$0xff] }
 0x201   : > { %v2323_v30 = vmul.f32 %v2195_v11, %v1939_v62 }
 0x202   : > { %v2397_v56 = vpop.permute.xlu0 %2396  ;;  %2510 = vrot.lane.b32.xlu1 %v2321_v57, %s3731_s13 }
 0x203   : > { %v2584_v10 = vadd.f32 %v3663_v13, %v2397_v56  ;;  %v3684_v13 = vld [vmem:[%s3827_s8 + $0xc8] sm:$0xff] }
 0x204   : > { %2512 = vrot.lane.b32.xlu0 %v2322_v60, %s3731_s13  ;;  %v2399_v51 = vpop.permute.xlu1 %2398  ;;  %v3683_v60 = vld [vmem:[%s3827_s8 + $0xc0] sm:$0xff] }
 0x205   : > { %2648 = vst.msk [vmem:[%s4754_s16 + $0x20] sm:$0xff] %vm394_vm0, %v2584_v10  ;;  %v2585_v29 = vadd.f32 %v3664_v4, %v2399_v51  ;;  %v3685_v51 = vld [vmem:[%s3827_s8 + $0xd0] sm:$0xff] }
 0x206   : > { %v2401_v44 = vpop.permute.xlu0 %2400  ;;  %2514 = vrot.lane.b32.xlu1 %v2323_v30, %s3731_s13 }
 0x207   : > { %v2586_v45 = vadd.f32 %v3665_v36, %v2401_v44  ;;  %2649 = vst.msk [vmem:[%s4754_s16 + $0x28] sm:$0xff] %vm394_vm0, %v2585_v29  ;;  %v3686_v44 = vld [vmem:[%s3827_s8 + $0xd8] sm:$0xff] }
 0x208   : > { %v2403_v61 = vpop.permute.xlu1 %2402 }
 0x209   : > { %2650 = vst.msk [vmem:[%s4754_s16 + $0x30] sm:$0xff] %vm394_vm0, %v2586_v45  ;;  %v2587_v3 = vadd.f32 %v3666_v14, %v2403_v61  ;;  %v3687_v61 = vld [vmem:[%s3827_s8 + $0xe0] sm:$0xff] }
 0x20a   : > { %v2405_v17 = vpop.permute.xlu0 %2404 }
 0x20b   : > { %v2588_v27 = vadd.f32 %v3667_v35, %v2405_v17  ;;  %2651 = vst.msk [vmem:[%s4754_s16 + $0x38] sm:$0xff] %vm394_vm0, %v2587_v3  ;;  %v3688_v17 = vld [vmem:[%s3827_s8 + $0xe8] sm:$0xff] }
 0x20c   : > { %v2407_v55 = vpop.permute.xlu1 %2406 }
 0x20d   : > { %2652 = vst.msk [vmem:[%s4754_s16 + $0x40] sm:$0xff] %vm394_vm0, %v2588_v27  ;;  %v2589_v50 = vadd.f32 %v3668_v33, %v2407_v55  ;;  %v3689_v55 = vld [vmem:[%s3827_s8 + $0xf0] sm:$0xff] }
 0x20e   : > { %v2409_v22 = vpop.permute.xlu0 %2408 }
 0x20f   : > { %v2590_v18 = vadd.f32 %v3669_v19, %v2409_v22  ;;  %2653 = vst.msk [vmem:[%s4754_s16 + $0x48] sm:$0xff] %vm394_vm0, %v2589_v50  ;;  %v3690_v22 = vld [vmem:[%s3827_s8 + $0xf8] sm:$0xff] }
 0x210   : > { %v2411_v42 = vpop.permute.xlu1 %2410 }
 0x211   : > { %2654 = vst.msk [vmem:[%s4754_s16 + $0x50] sm:$0xff] %vm394_vm0, %v2590_v18  ;;  %v2591_v1 = vadd.f32 %v3670_v7, %v2411_v42  ;;  %v3691_v42 = vld [vmem:[%s3827_s8 + $0x100] sm:$0xff] }
 0x212   : > { %v2413_v21 = vpop.permute.xlu0 %2412 }
 0x213   : > { %v2592_v49 = vadd.f32 %v3671_v15, %v2413_v21  ;;  %2655 = vst.msk [vmem:[%s4754_s16 + $0x58] sm:$0xff] %vm394_vm0, %v2591_v1  ;;  %v3692_v21 = vld [vmem:[%s3827_s8 + $0x108] sm:$0xff] }
 0x214   : > { %v2415_v59 = vpop.permute.xlu1 %2414 }
 0x215   : > { %2656 = vst.msk [vmem:[%s4754_s16 + $0x60] sm:$0xff] %vm394_vm0, %v2592_v49  ;;  %v2593_v23 = vadd.f32 %v3672_v39, %v2415_v59  ;;  %v3693_v59 = vld [vmem:[%s3827_s8 + $0x110] sm:$0xff] }
 0x216   : > { %v2417_v8 = vpop.permute.xlu0 %2416 }
 0x217   : > { %v2594_v24 = vadd.f32 %v3673_v31, %v2417_v8  ;;  %2657 = vst.msk [vmem:[%s4754_s16 + $0x68] sm:$0xff] %vm394_vm0, %v2593_v23  ;;  %v3694_v8 = vld [vmem:[%s3827_s8 + $0x118] sm:$0xff] }
 0x218   : > { %v2419_v0 = vpop.permute.xlu1 %2418 }
 0x219   : > { %2658 = vst.msk [vmem:[%s4754_s16 + $0x70] sm:$0xff] %vm394_vm0, %v2594_v24  ;;  %v2595_v2 = vadd.f32 %v3674_v37, %v2419_v0  ;;  %v3695_v0 = vld [vmem:[%s3827_s8 + $0x120] sm:$0xff] }
 0x21a   : > { %v2421_v26 = vpop.permute.xlu0 %2420 }
 0x21b   : > { %v2596_v5 = vadd.f32 %v3675_v25, %v2421_v26  ;;  %2659 = vst.msk [vmem:[%s4754_s16 + $0x78] sm:$0xff] %vm394_vm0, %v2595_v2  ;;  %v3696_v26 = vld [vmem:[%s3827_s8 + $0x128] sm:$0xff] }
 0x21c   : > { %v2423_v20 = vpop.permute.xlu1 %2422 }
 0x21d   : > { %2660 = vst.msk [vmem:[%s4754_s16 + $0x80] sm:$0xff] %vm394_vm0, %v2596_v5  ;;  %v2597_v28 = vadd.f32 %v3676_v63, %v2423_v20  ;;  %v3697_v20 = vld [vmem:[%s3827_s8 + $0x130] sm:$0xff] }
 0x21e   : > { %v2425_v43 = vpop.permute.xlu0 %2424 }
 0x21f   : > { %v2598_v53 = vadd.f32 %v3677_v16, %v2425_v43  ;;  %2661 = vst.msk [vmem:[%s4754_s16 + $0x88] sm:$0xff] %vm394_vm0, %v2597_v28  ;;  %v3698_v43 = vld [vmem:[%s3827_s8 + $0x138] sm:$0xff] }
 0x220   : > { %v2427_v38 = vpop.permute.xlu1 %2426 }
 0x221   : > { %2662 = vst.msk [vmem:[%s4754_s16 + $0x90] sm:$0xff] %vm394_vm0, %v2598_v53  ;;  %v2599_v12 = vadd.f32 %v3678_v58, %v2427_v38  ;;  %v3699_v38 = vld [vmem:[%s3827_s8 + $0x140] sm:$0xff] }
 0x222   : > { %v2429_v52 = vpop.permute.xlu0 %2428 }
 0x223   : > { %v2600_v34 = vadd.f32 %v3679_v6, %v2429_v52  ;;  %2663 = vst.msk [vmem:[%s4754_s16 + $0x98] sm:$0xff] %vm394_vm0, %v2599_v12  ;;  %v3700_v52 = vld [vmem:[%s3827_s8 + $0x148] sm:$0xff] }
 0x224   : > { %v2431_v32 = vpop.permute.xlu1 %2430 }
 0x225   : > { %2664 = vst.msk [vmem:[%s4754_s16 + $0xa0] sm:$0xff] %vm394_vm0, %v2600_v34  ;;  %v2601_v54 = vadd.f32 %v3680_v9, %v2431_v32  ;;  %v3701_v32 = vld [vmem:[%s3827_s8 + $0x150] sm:$0xff] }
 0x226   : > { %v2433_v41 = vpop.permute.xlu0 %2432 }
 0x227   : > { %v2602_v46 = vadd.f32 %v3681_v47, %v2433_v41  ;;  %2665 = vst.msk [vmem:[%s4754_s16 + $0xa8] sm:$0xff] %vm394_vm0, %v2601_v54  ;;  %v3702_v41 = vld [vmem:[%s3827_s8 + $0x158] sm:$0xff] }
 0x228   : > { %v2435_v48 = vpop.permute.xlu1 %2434 }
 0x229   : > { %2666 = vst.msk [vmem:[%s4754_s16 + $0xb0] sm:$0xff] %vm394_vm0, %v2602_v46  ;;  %v2603_v57 = vadd.f32 %v3682_v40, %v2435_v48  ;;  %v3703_v48 = vld [vmem:[%s3827_s8 + $0x160] sm:$0xff] }
 0x22a   : > { %v2437_v11 = vpop.permute.xlu0 %2436 }
 0x22b   : > { %v2604_v56 = vadd.f32 %v3683_v60, %v2437_v11  ;;  %2667 = vst.msk [vmem:[%s4754_s16 + $0xb8] sm:$0xff] %vm394_vm0, %v2603_v57  ;;  %v3704_v11 = vld [vmem:[%s3827_s8 + $0x168] sm:$0xff] }
 0x22c   : > { %v2439_v62 = vpop.permute.xlu1 %2438 }
 0x22d   : > { %2668 = vst.msk [vmem:[%s4754_s16 + $0xc0] sm:$0xff] %vm394_vm0, %v2604_v56  ;;  %v2605_v10 = vadd.f32 %v3684_v13, %v2439_v62  ;;  %v3705_v62 = vld [vmem:[%s3827_s8 + $0x170] sm:$0xff] }
 0x22e   : > { %v2441_v30 = vpop.permute.xlu0 %2440 }
 0x22f   : > { %v2606_v4 = vadd.f32 %v3685_v51, %v2441_v30  ;;  %2669 = vst.msk [vmem:[%s4754_s16 + $0xc8] sm:$0xff] %vm394_vm0, %v2605_v10  ;;  %v3706_v30 = vld [vmem:[%s3827_s8 + $0x178] sm:$0xff] }
 0x230   : > { %v2443_v29 = vpop.permute.xlu1 %2442 }
 0x231   : > { %2670 = vst.msk [vmem:[%s4754_s16 + $0xd0] sm:$0xff] %vm394_vm0, %v2606_v4  ;;  %v2607_v36 = vadd.f32 %v3686_v44, %v2443_v29  ;;  %v3707_v29 = vld [vmem:[%s3827_s8 + $0x180] sm:$0xff] }
 0x232   : > { %v2445_v45 = vpop.permute.xlu0 %2444 }
 0x233   : > { %v2608_v14 = vadd.f32 %v3687_v61, %v2445_v45  ;;  %2671 = vst.msk [vmem:[%s4754_s16 + $0xd8] sm:$0xff] %vm394_vm0, %v2607_v36  ;;  %v3708_v45 = vld [vmem:[%s3827_s8 + $0x188] sm:$0xff] }
 0x234   : > { %v2447_v3 = vpop.permute.xlu1 %2446 }
 0x235   : > { %2672 = vst.msk [vmem:[%s4754_s16 + $0xe0] sm:$0xff] %vm394_vm0, %v2608_v14  ;;  %v2609_v35 = vadd.f32 %v3688_v17, %v2447_v3  ;;  %v3709_v3 = vld [vmem:[%s3827_s8 + $0x190] sm:$0xff] }
 0x236   : > { %v2449_v27 = vpop.permute.xlu0 %2448 }
 0x237   : > { %v2610_v33 = vadd.f32 %v3689_v55, %v2449_v27  ;;  %2673 = vst.msk [vmem:[%s4754_s16 + $0xe8] sm:$0xff] %vm394_vm0, %v2609_v35  ;;  %v3710_v27 = vld [vmem:[%s3827_s8 + $0x198] sm:$0xff] }
 0x238   : > { %v2451_v50 = vpop.permute.xlu1 %2450 }
 0x239   : > { %2674 = vst.msk [vmem:[%s4754_s16 + $0xf0] sm:$0xff] %vm394_vm0, %v2610_v33  ;;  %v2611_v19 = vadd.f32 %v3690_v22, %v2451_v50  ;;  %v3711_v50 = vld [vmem:[%s3827_s8 + $0x1a0] sm:$0xff] }
 0x23a   : > { %v2453_v18 = vpop.permute.xlu0 %2452 }
 0x23b   : > { %v2612_v7 = vadd.f32 %v3691_v42, %v2453_v18  ;;  %2675 = vst.msk [vmem:[%s4754_s16 + $0xf8] sm:$0xff] %vm394_vm0, %v2611_v19  ;;  %v3712_v18 = vld [vmem:[%s3827_s8 + $0x1a8] sm:$0xff] }
 0x23c   : > { %v2455_v1 = vpop.permute.xlu1 %2454 }
 0x23d   : > { %2676 = vst.msk [vmem:[%s4754_s16 + $0x100] sm:$0xff] %vm394_vm0, %v2612_v7  ;;  %v2613_v15 = vadd.f32 %v3692_v21, %v2455_v1  ;;  %v3713_v1 = vld [vmem:[%s3827_s8 + $0x1b0] sm:$0xff] }
 0x23e   : > { %v2457_v49 = vpop.permute.xlu0 %2456 }
 0x23f   : > { %v2614_v39 = vadd.f32 %v3693_v59, %v2457_v49  ;;  %2677 = vst.msk [vmem:[%s4754_s16 + $0x108] sm:$0xff] %vm394_vm0, %v2613_v15  ;;  %v3714_v49 = vld [vmem:[%s3827_s8 + $0x1b8] sm:$0xff] }
 0x240   : > { %v2459_v23 = vpop.permute.xlu1 %2458 }
 0x241   : > { %2678 = vst.msk [vmem:[%s4754_s16 + $0x110] sm:$0xff] %vm394_vm0, %v2614_v39  ;;  %v2615_v31 = vadd.f32 %v3694_v8, %v2459_v23  ;;  %v3715_v23 = vld [vmem:[%s3827_s8 + $0x1c0] sm:$0xff] }
 0x242   : > { %v2461_v24 = vpop.permute.xlu0 %2460 }
 0x243   : > { %v2616_v37 = vadd.f32 %v3695_v0, %v2461_v24  ;;  %2679 = vst.msk [vmem:[%s4754_s16 + $0x118] sm:$0xff] %vm394_vm0, %v2615_v31  ;;  %v3716_v24 = vld [vmem:[%s3827_s8 + $0x1c8] sm:$0xff] }
 0x244   : > { %v2463_v2 = vpop.permute.xlu1 %2462 }
 0x245   : > { %2680 = vst.msk [vmem:[%s4754_s16 + $0x120] sm:$0xff] %vm394_vm0, %v2616_v37  ;;  %v2617_v25 = vadd.f32 %v3696_v26, %v2463_v2  ;;  %v3717_v2 = vld [vmem:[%s3827_s8 + $0x1d0] sm:$0xff] }
 0x246   : > { %v2465_v5 = vpop.permute.xlu0 %2464 }
 0x247   : > { %v2618_v63 = vadd.f32 %v3697_v20, %v2465_v5  ;;  %2681 = vst.msk [vmem:[%s4754_s16 + $0x128] sm:$0xff] %vm394_vm0, %v2617_v25  ;;  %v3718_v5 = vld [vmem:[%s3827_s8 + $0x1d8] sm:$0xff] }
 0x248   : > { %v2467_v28 = vpop.permute.xlu1 %2466 }
 0x249   : > { %2682 = vst.msk [vmem:[%s4754_s16 + $0x130] sm:$0xff] %vm394_vm0, %v2618_v63  ;;  %v2619_v16 = vadd.f32 %v3698_v43, %v2467_v28  ;;  %v3719_v28 = vld [vmem:[%s3827_s8 + $0x1e0] sm:$0xff] }
 0x24a   : > { %v2469_v53 = vpop.permute.xlu0 %2468 }
 0x24b   : > { %v2620_v58 = vadd.f32 %v3699_v38, %v2469_v53  ;;  %2683 = vst.msk [vmem:[%s4754_s16 + $0x138] sm:$0xff] %vm394_vm0, %v2619_v16  ;;  %v3720_v53 = vld [vmem:[%s3827_s8 + $0x1e8] sm:$0xff] }
 0x24c   : > { %v2471_v12 = vpop.permute.xlu1 %2470 }
 0x24d   : > { %2684 = vst.msk [vmem:[%s4754_s16 + $0x140] sm:$0xff] %vm394_vm0, %v2620_v58  ;;  %v2621_v6 = vadd.f32 %v3700_v52, %v2471_v12  ;;  %v3721_v12 = vld [vmem:[%s3827_s8 + $0x1f0] sm:$0xff] }
 0x24e   : > { %v2473_v34 = vpop.permute.xlu0 %2472 }
 0x24f   : > { %v2622_v9 = vadd.f32 %v3701_v32, %v2473_v34  ;;  %2685 = vst.msk [vmem:[%s4754_s16 + $0x148] sm:$0xff] %vm394_vm0, %v2621_v6  ;;  %v3722_v34 = vld [vmem:[%s3827_s8 + $0x1f8] sm:$0xff] }
 0x250   : > { %v2475_v54 = vpop.permute.xlu1 %2474 }
 0x251   : > { %2686 = vst.msk [vmem:[%s4754_s16 + $0x150] sm:$0xff] %vm394_vm0, %v2622_v9  ;;  %v2623_v47 = vadd.f32 %v3702_v41, %v2475_v54 }
 0x252   : > { %v2477_v46 = vpop.permute.xlu0 %2476 }
 0x253   : > { %v2624_v40 = vadd.f32 %v3703_v48, %v2477_v46  ;;  %2687 = vst.msk [vmem:[%s4754_s16 + $0x158] sm:$0xff] %vm394_vm0, %v2623_v47 }
 0x254   : > { %v2479_v57 = vpop.permute.xlu1 %2478 }
 0x255   : > { %2688 = vst.msk [vmem:[%s4754_s16 + $0x160] sm:$0xff] %vm394_vm0, %v2624_v40  ;;  %v2625_v60 = vadd.f32 %v3704_v11, %v2479_v57 }
 0x256   : > { %v2481_v56 = vpop.permute.xlu0 %2480 }
 0x257   : > { %v2626_v13 = vadd.f32 %v3705_v62, %v2481_v56  ;;  %2689 = vst.msk [vmem:[%s4754_s16 + $0x168] sm:$0xff] %vm394_vm0, %v2625_v60 }
 0x258   : > { %v2483_v10 = vpop.permute.xlu1 %2482 }
 0x259   : > { %2690 = vst.msk [vmem:[%s4754_s16 + $0x170] sm:$0xff] %vm394_vm0, %v2626_v13  ;;  %v2627_v51 = vadd.f32 %v3706_v30, %v2483_v10 }
 0x25a   : > { %v2485_v4 = vpop.permute.xlu0 %2484 }
 0x25b   : > { %v2628_v44 = vadd.f32 %v3707_v29, %v2485_v4  ;;  %2691 = vst.msk [vmem:[%s4754_s16 + $0x178] sm:$0xff] %vm394_vm0, %v2627_v51 }
 0x25c   : > { %v2487_v36 = vpop.permute.xlu1 %2486 }
 0x25d   : > { %2692 = vst.msk [vmem:[%s4754_s16 + $0x180] sm:$0xff] %vm394_vm0, %v2628_v44  ;;  %v2629_v61 = vadd.f32 %v3708_v45, %v2487_v36 }
 0x25e   : > { %v2489_v14 = vpop.permute.xlu0 %2488 }
 0x25f   : > { %v2630_v17 = vadd.f32 %v3709_v3, %v2489_v14  ;;  %2693 = vst.msk [vmem:[%s4754_s16 + $0x188] sm:$0xff] %vm394_vm0, %v2629_v61 }
 0x260   : > { %v2491_v35 = vpop.permute.xlu1 %2490 }
 0x261   : > { %2694 = vst.msk [vmem:[%s4754_s16 + $0x190] sm:$0xff] %vm394_vm0, %v2630_v17  ;;  %v2631_v55 = vadd.f32 %v3710_v27, %v2491_v35 }
 0x262   : > { %v2493_v33 = vpop.permute.xlu0 %2492 }
 0x263   : > { %v2632_v22 = vadd.f32 %v3711_v50, %v2493_v33  ;;  %2695 = vst.msk [vmem:[%s4754_s16 + $0x198] sm:$0xff] %vm394_vm0, %v2631_v55 }
 0x264   : > { %v2495_v19 = vpop.permute.xlu1 %2494 }
 0x265   : > { %2696 = vst.msk [vmem:[%s4754_s16 + $0x1a0] sm:$0xff] %vm394_vm0, %v2632_v22  ;;  %v2633_v42 = vadd.f32 %v3712_v18, %v2495_v19 }
 0x266   : > { %v2497_v7 = vpop.permute.xlu0 %2496 }
 0x267   : > { %v2634_v21 = vadd.f32 %v3713_v1, %v2497_v7  ;;  %2697 = vst.msk [vmem:[%s4754_s16 + $0x1a8] sm:$0xff] %vm394_vm0, %v2633_v42 }
 0x268   : > { %v2499_v15 = vpop.permute.xlu1 %2498 }
 0x269   : > { %2698 = vst.msk [vmem:[%s4754_s16 + $0x1b0] sm:$0xff] %vm394_vm0, %v2634_v21  ;;  %v2635_v59 = vadd.f32 %v3714_v49, %v2499_v15 }
 0x26a   : > { %v2501_v39 = vpop.permute.xlu0 %2500 }
 0x26b   : > { %v2636_v8 = vadd.f32 %v3715_v23, %v2501_v39  ;;  %2699 = vst.msk [vmem:[%s4754_s16 + $0x1b8] sm:$0xff] %vm394_vm0, %v2635_v59 }
 0x26c   : > { %v2503_v31 = vpop.permute.xlu1 %2502 }
 0x26d   : > { %2700 = vst.msk [vmem:[%s4754_s16 + $0x1c0] sm:$0xff] %vm394_vm0, %v2636_v8  ;;  %v2637_v0 = vadd.f32 %v3716_v24, %v2503_v31 }
 0x26e   : > { %v2505_v37 = vpop.permute.xlu0 %2504 }
 0x26f   : > { %v2638_v26 = vadd.f32 %v3717_v2, %v2505_v37  ;;  %2701 = vst.msk [vmem:[%s4754_s16 + $0x1c8] sm:$0xff] %vm394_vm0, %v2637_v0 }
 0x270   : > { %v2507_v25 = vpop.permute.xlu1 %2506 }
 0x271   : > { %2702 = vst.msk [vmem:[%s4754_s16 + $0x1d0] sm:$0xff] %vm394_vm0, %v2638_v26  ;;  %v2639_v20 = vadd.f32 %v3718_v5, %v2507_v25 }
 0x272   : > { %v2509_v63 = vpop.permute.xlu0 %2508 }
 0x273   : > { %v2640_v43 = vadd.f32 %v3719_v28, %v2509_v63  ;;  %2703 = vst.msk [vmem:[%s4754_s16 + $0x1d8] sm:$0xff] %vm394_vm0, %v2639_v20 }
 0x274   : > { %v2511_v16 = vpop.permute.xlu1 %2510 }
 0x275   : > { %2704 = vst.msk [vmem:[%s4754_s16 + $0x1e0] sm:$0xff] %vm394_vm0, %v2640_v43  ;;  %v2641_v38 = vadd.f32 %v3720_v53, %v2511_v16 }
 0x276   : > { %v2513_v58 = vpop.permute.xlu0 %2512 }
 0x277   : > { %v2642_v52 = vadd.f32 %v3721_v12, %v2513_v58  ;;  %2705 = vst.msk [vmem:[%s4754_s16 + $0x1e8] sm:$0xff] %vm394_vm0, %v2641_v38 }
 0x278   : > { %v2515_v6 = vpop.permute.xlu1 %2514 }
 0x279   : > { %2706 = vst.msk [vmem:[%s4754_s16 + $0x1f0] sm:$0xff] %vm394_vm0, %v2642_v52  ;;  %v2643_v32 = vadd.f32 %v3722_v34, %v2515_v6 }
 0x27b   : > { %2707 = vst.msk [vmem:[%s4754_s16 + $0x1f8] sm:$0xff] %vm394_vm0, %v2643_v32 }
 0x27c PF: > { %s15_s18 = sadd.s32 1, %s3729_s18  }
 0x27d   : > { %p12_p4 = scmp.ge.s32.totalorder %s15_s18, 4  }
 0x27f   :  { %14 = sbr.rel (!%p12_p4) target bundleno = 1 (0x1), region = 73 }

</bundles_post_ra>
